<compile_context>
chip_gen: v5e
topology: v5e:2x2
jax: 0.10.0
libtpu: 0.0.40
codegen_flags: <defaults>
</compile_context>

<pallas_src>
import functools

import jax
import jax.numpy as jnp
import numpy as np
from jax.experimental import pallas as pl
from jax.experimental.pallas import tpu as pltpu


# ---------------------------------------------------------------------------
# Fused Pallas kernel: encoder -> middle -> decoder(+upsample) -> head.
# Activations are (C, B*H*W): channels on sublanes, batch+space packed lane-dense.
# ---------------------------------------------------------------------------
def _fused_seg_kernel(x_ref, mhi_ref, mlo_ref,
                      w_enc_ref, b_enc_ref, s_dn_ref,
                      w_mid_ref, b_mid_ref, s_up_ref,
                      w_dec_ref, b_dec_ref,
                      w_head_ref, b_head_ref,
                      o_ref, *, img_w_hi, img_w_lo):
    f32 = jnp.float32

    def tap_stack(a, mask, img_w):
        """Stack the 9 shifted + boundary-masked 3x3-tap copies of `a` along
        sublanes: (C, N) -> (9*C, N).  Rolls ride the XLU, masks the VPU; any
        cross-image wrap of a roll is always killed by the boundary mask."""
        n = a.shape[-1]
        taps = []
        for di in range(3):
            for dj in range(3):
                t = di * 3 + dj
                s = (di - 1) * img_w + (dj - 1)          # flat source offset
                r = a if s == 0 else pltpu.roll(a, shift=(-s) % n, axis=1)
                if not (di == 1 and dj == 1):            # center tap mask == all ones
                    r = r * mask[t:t + 1, :]
                taps.append(r)
        return jnp.concatenate(taps, axis=0)

    x = x_ref[...]
    mhi = mhi_ref[...]
    mlo = mlo_ref[...]

    # ---- encoder: 3x3 stride-2 pad-1 conv + ReLU ---------------------------
    # One packed channel matmul at full res, then ONE stride-2 selection matmul.
    e = jnp.dot(w_enc_ref[...], tap_stack(x, mhi, img_w_hi),
                preferred_element_type=f32)                       # (C_enc, B*HW_hi)
    e = jnp.dot(e, s_dn_ref[...], preferred_element_type=f32)     # (C_enc, B*HW_lo)
    e = jnp.maximum(e + b_enc_ref[...], 0.0)

    # ---- middle: 3x3 stride-1 pad-1 conv + ReLU (rolls only, no resample) --
    m = jnp.dot(w_mid_ref[...], tap_stack(e, mlo, img_w_lo),
                preferred_element_type=f32)                       # (C_mid, B*HW_lo)
    m = jnp.maximum(m + b_mid_ref[...], 0.0)

    # ---- decoder: ONE nearest-2x upsample matmul, then 3x3 conv + ReLU -----
    u = jnp.dot(m, s_up_ref[...], preferred_element_type=f32)     # (C_mid, B*HW_hi)
    d = jnp.dot(w_dec_ref[...], tap_stack(u, mhi, img_w_hi),
                preferred_element_type=f32)                       # (C_dec, B*HW_hi)
    d = jnp.maximum(d + b_dec_ref[...], 0.0)

    # ---- head: 1x1 conv epilogue, single lane-dense (B*H*W wide) store -----
    o = jnp.dot(w_head_ref[...], d, preferred_element_type=f32) + b_head_ref[...]
    o_ref[...] = o.astype(o_ref.dtype)


def _fused_forward(x2, ops, img_w_hi, img_w_lo, n_cls):
    """x2: (C_in, B*H*W) f32; ops: constant/parameter operands (all VMEM-resident)."""
    kernel = functools.partial(_fused_seg_kernel,
                               img_w_hi=img_w_hi, img_w_lo=img_w_lo)
    return pl.pallas_call(
        kernel,
        out_shape=jax.ShapeDtypeStruct((n_cls, x2.shape[1]), jnp.float32),
        in_specs=[pl.BlockSpec(memory_space=pltpu.MemorySpace.VMEM)
                  for _ in range(1 + len(ops))],
        out_specs=pl.BlockSpec(memory_space=pltpu.MemorySpace.VMEM),
    )(x2, *ops)


# ---------------------------------------------------------------------------
# Host-side (numpy) compile-time constants: boundary masks + resample selections.
# ---------------------------------------------------------------------------
def _make_tap_masks(B, H, W):
    """(9, B*H*W) f32: 1 where tap (di, dj) of a pad-1 3x3 conv is in bounds."""
    h = np.arange(H)[:, None]
    w = np.arange(W)[None, :]
    m = np.zeros((9, H * W), np.float32)
    for di in range(3):
        for dj in range(3):
            valid = ((h + di - 1 >= 0) & (h + di - 1 < H) &
                     (w + dj - 1 >= 0) & (w + dj - 1 < W))
            m[di * 3 + dj] = valid.reshape(-1).astype(np.float32)
    return np.tile(m, (1, B))


def _make_downsample(B, H, W):
    """(B*H*W, B*(H//2)*(W//2)) block-diagonal 0/1 stride-2 selection."""
    Hl, Wl = H // 2, W // 2
    hw_hi, hw_lo = H * W, Hl * Wl
    s = np.zeros((B * hw_hi, B * hw_lo), np.float32)
    for b in range(B):
        for hl in range(Hl):
            for wl in range(Wl):
                s[b * hw_hi + (2 * hl) * W + 2 * wl, b * hw_lo + hl * Wl + wl] = 1.0
    return s


def _make_upsample(B, H, W):
    """(B*(H//2)*(W//2), B*H*W) block-diagonal 0/1 nearest-2x upsample selection."""
    Hl, Wl = H // 2, W // 2
    hw_hi, hw_lo = H * W, Hl * Wl
    s = np.zeros((B * hw_lo, B * hw_hi), np.float32)
    for b in range(B):
        for h in range(H):
            for w in range(W):
                s[b * hw_lo + (h // 2) * Wl + w // 2, b * hw_hi + h * W + w] = 1.0
    return s


def _pack_conv3x3(w_oihw):
    """OIHW (O, I, 3, 3) -> (O, 9*I); column order (di*3+dj)*I + i matches tap_stack."""
    o, i = w_oihw.shape[0], w_oihw.shape[1]
    return jnp.transpose(w_oihw, (0, 2, 3, 1)).reshape(o, 9 * i)


# ---------------------------------------------------------------------------
# Model: parameter init + forward (external API is NCHW, PyTorch convention)
# ---------------------------------------------------------------------------
def init_params(key, c_in=4, c_enc=8, c_mid=16, c_dec=8, n_cls=3):
    ks = jax.random.split(key, 8)

    def conv_init(k, cout, cin, kh, kw):
        fan_in = cin * kh * kw
        scale = 1.0 / jnp.sqrt(fan_in)
        return jax.random.uniform(k, (cout, cin, kh, kw), jnp.float32, -scale, scale)

    return {
        "enc_w": conv_init(ks[0], c_enc, c_in, 3, 3),
        "enc_b": jax.random.uniform(ks[1], (c_enc,), jnp.float32, -0.1, 0.1),
        "mid_w": conv_init(ks[2], c_mid, c_enc, 3, 3),
        "mid_b": jax.random.uniform(ks[3], (c_mid,), jnp.float32, -0.1, 0.1),
        "dec_w": conv_init(ks[4], c_dec, c_mid, 3, 3),
        "dec_b": jax.random.uniform(ks[5], (c_dec,), jnp.float32, -0.1, 0.1),
        "head_w": conv_init(ks[6], n_cls, c_dec, 1, 1),
        "head_b": jax.random.uniform(ks[7], (n_cls,), jnp.float32, -0.1, 0.1),
    }


def model_forward(params, x_nchw):
    B, C, H, W = x_nchw.shape
    assert H % 2 == 0 and W % 2 == 0, "H, W must be even (stride-2 encoder + 2x decoder)"
    Hl, Wl = H // 2, W // 2
    n_cls = params["head_w"].shape[0]

    # Spatial-structure constants: host-side numpy, folded at compile time.
    mhi = jnp.asarray(_make_tap_masks(B, H, W))
    mlo = jnp.asarray(_make_tap_masks(B, Hl, Wl))
    s_dn = jnp.asarray(_make_downsample(B, H, W))
    s_up = jnp.asarray(_make_upsample(B, H, W))

    ops = (mhi, mlo,
           _pack_conv3x3(params["enc_w"]), params["enc_b"].reshape(-1, 1), s_dn,
           _pack_conv3x3(params["mid_w"]), params["mid_b"].reshape(-1, 1), s_up,
           _pack_conv3x3(params["dec_w"]), params["dec_b"].reshape(-1, 1),
           params["head_w"][:, :, 0, 0], params["head_b"].reshape(-1, 1))

    # NCHW -> (C, B*H*W): channels on sublanes, batch packed along lanes (free-ish).
    x2 = jnp.transpose(x_nchw, (1, 0, 2, 3)).reshape(C, B * H * W)
    out = _fused_forward(x2, ops, W, Wl, n_cls)
    return jnp.transpose(out.reshape(n_cls, B, H, W), (1, 0, 2, 3))


# ---------------------------------------------------------------------------
# Pure-JAX reference (for correctness check only)
# ---------------------------------------------------------------------------
def _reference_forward(params, x):
    dn = ("NCHW", "OIHW", "NCHW")

    def conv(h, w, b, stride, pad, relu):
        y = jax.lax.conv_general_dilated(
            h, w, window_strides=(stride, stride),
            padding=[(pad, pad), (pad, pad)],
            dimension_numbers=dn, precision=jax.lax.Precision.HIGHEST)
        y = y + b.reshape(1, -1, 1, 1)
        return jnp.maximum(y, 0.0) if relu else y

    f = conv(x, params["enc_w"], params["enc_b"], 2, 1, True)
    f = conv(f, params["mid_w"], params["mid_b"], 1, 1, True)
    f = jnp.repeat(jnp.repeat(f, 2, axis=2), 2, axis=3)
    f = conv(f, params["dec_w"], params["dec_b"], 1, 1, True)
    return conv(f, params["head_w"], params["head_b"], 1, 0, False)


if __name__ == "__main__":
    key = jax.random.PRNGKey(0)
    k_param, k_x = jax.random.split(key)
    params = init_params(k_param)
    x = jax.random.normal(k_x, (2, 4, 16, 16), dtype=jnp.float32)  # NCHW

    fwd = jax.jit(model_forward)
    out = jax.block_until_ready(fwd(params, x))
    assert out.shape == (2, 3, 16, 16), out.shape
    assert out.dtype == jnp.float32

    ref = jax.block_until_ready(_reference_forward(params, x))
    max_err = float(jnp.max(jnp.abs(out - ref)))
    assert jnp.allclose(out, ref, rtol=1e-3, atol=1e-3), max_err

    print("KERNEL_OK")
</pallas_src>

<mosaic_0001>
module attributes {stable_mosaic.version = 11 : i64} {
  func.func @_fused_seg_kernel(%arg0: memref<4x512xf32, #tpu.memory_space<vmem>>, %arg1: memref<9x512xf32, #tpu.memory_space<vmem>>, %arg2: memref<9x128xf32, #tpu.memory_space<vmem>>, %arg3: memref<8x36xf32, #tpu.memory_space<vmem>>, %arg4: memref<8x1xf32, #tpu.memory_space<vmem>>, %arg5: memref<512x128xf32, #tpu.memory_space<vmem>>, %arg6: memref<16x72xf32, #tpu.memory_space<vmem>>, %arg7: memref<16x1xf32, #tpu.memory_space<vmem>>, %arg8: memref<128x512xf32, #tpu.memory_space<vmem>>, %arg9: memref<8x144xf32, #tpu.memory_space<vmem>>, %arg10: memref<8x1xf32, #tpu.memory_space<vmem>>, %arg11: memref<3x8xf32, #tpu.memory_space<vmem>>, %arg12: memref<3x1xf32, #tpu.memory_space<vmem>>, %arg13: memref<3x512xf32, #tpu.memory_space<vmem>>) attributes {dimension_semantics = [], scalar_prefetch = 0 : i64, scratch_operands = 0 : i64, tpu.core_type = #tpu.core_type<tc>} {
    %c0 = arith.constant 0 : index
    %c0_0 = arith.constant 0 : index
    %0 = vector.load %arg0[%c0, %c0_0] : memref<4x512xf32, #tpu.memory_space<vmem>>, vector<4x512xf32>
    %c0_1 = arith.constant 0 : index
    %c0_2 = arith.constant 0 : index
    %1 = vector.load %arg1[%c0_1, %c0_2] : memref<9x512xf32, #tpu.memory_space<vmem>>, vector<9x512xf32>
    %c0_3 = arith.constant 0 : index
    %c0_4 = arith.constant 0 : index
    %2 = vector.load %arg2[%c0_3, %c0_4] : memref<9x128xf32, #tpu.memory_space<vmem>>, vector<9x128xf32>
    %c0_5 = arith.constant 0 : index
    %c0_6 = arith.constant 0 : index
    %3 = vector.load %arg3[%c0_5, %c0_6] : memref<8x36xf32, #tpu.memory_space<vmem>>, vector<8x36xf32>
    %c17_i32 = arith.constant 17 : i32
    %4 = tpu.dynamic_rotate %0 by %c17_i32 dim 1 : vector<4x512xf32>, i32 -> vector<4x512xf32>
    %5 = vector.extract_strided_slice %1 {offsets = [0, 0], sizes = [1, 512], strides = [1, 1]} : vector<9x512xf32> to vector<1x512xf32>
    %6 = vector.broadcast %5 : vector<1x512xf32> to vector<4x512xf32>
    %7 = arith.mulf %4, %6 : vector<4x512xf32>
    %c16_i32 = arith.constant 16 : i32
    %8 = tpu.dynamic_rotate %0 by %c16_i32 dim 1 : vector<4x512xf32>, i32 -> vector<4x512xf32>
    %9 = vector.extract_strided_slice %1 {offsets = [1, 0], sizes = [1, 512], strides = [1, 1]} : vector<9x512xf32> to vector<1x512xf32>
    %10 = vector.broadcast %9 : vector<1x512xf32> to vector<4x512xf32>
    %11 = arith.mulf %8, %10 : vector<4x512xf32>
    %c15_i32 = arith.constant 15 : i32
    %12 = tpu.dynamic_rotate %0 by %c15_i32 dim 1 : vector<4x512xf32>, i32 -> vector<4x512xf32>
    %13 = vector.extract_strided_slice %1 {offsets = [2, 0], sizes = [1, 512], strides = [1, 1]} : vector<9x512xf32> to vector<1x512xf32>
    %14 = vector.broadcast %13 : vector<1x512xf32> to vector<4x512xf32>
    %15 = arith.mulf %12, %14 : vector<4x512xf32>
    %c1_i32 = arith.constant 1 : i32
    %16 = tpu.dynamic_rotate %0 by %c1_i32 dim 1 : vector<4x512xf32>, i32 -> vector<4x512xf32>
    %17 = vector.extract_strided_slice %1 {offsets = [3, 0], sizes = [1, 512], strides = [1, 1]} : vector<9x512xf32> to vector<1x512xf32>
    %18 = vector.broadcast %17 : vector<1x512xf32> to vector<4x512xf32>
    %19 = arith.mulf %16, %18 : vector<4x512xf32>
    %c511_i32 = arith.constant 511 : i32
    %20 = tpu.dynamic_rotate %0 by %c511_i32 dim 1 : vector<4x512xf32>, i32 -> vector<4x512xf32>
    %21 = vector.extract_strided_slice %1 {offsets = [5, 0], sizes = [1, 512], strides = [1, 1]} : vector<9x512xf32> to vector<1x512xf32>
    %22 = vector.broadcast %21 : vector<1x512xf32> to vector<4x512xf32>
    %23 = arith.mulf %20, %22 : vector<4x512xf32>
    %c497_i32 = arith.constant 497 : i32
    %24 = tpu.dynamic_rotate %0 by %c497_i32 dim 1 : vector<4x512xf32>, i32 -> vector<4x512xf32>
    %25 = vector.extract_strided_slice %1 {offsets = [6, 0], sizes = [1, 512], strides = [1, 1]} : vector<9x512xf32> to vector<1x512xf32>
    %26 = vector.broadcast %25 : vector<1x512xf32> to vector<4x512xf32>
    %27 = arith.mulf %24, %26 : vector<4x512xf32>
    %c496_i32 = arith.constant 496 : i32
    %28 = tpu.dynamic_rotate %0 by %c496_i32 dim 1 : vector<4x512xf32>, i32 -> vector<4x512xf32>
    %29 = vector.extract_strided_slice %1 {offsets = [7, 0], sizes = [1, 512], strides = [1, 1]} : vector<9x512xf32> to vector<1x512xf32>
    %30 = vector.broadcast %29 : vector<1x512xf32> to vector<4x512xf32>
    %31 = arith.mulf %28, %30 : vector<4x512xf32>
    %c495_i32 = arith.constant 495 : i32
    %32 = tpu.dynamic_rotate %0 by %c495_i32 dim 1 : vector<4x512xf32>, i32 -> vector<4x512xf32>
    %33 = vector.extract_strided_slice %1 {offsets = [8, 0], sizes = [1, 512], strides = [1, 1]} : vector<9x512xf32> to vector<1x512xf32>
    %34 = vector.broadcast %33 : vector<1x512xf32> to vector<4x512xf32>
    %35 = arith.mulf %32, %34 : vector<4x512xf32>
    %36 = tpu.concatenate %7, %11, %15, %19, %0, %23, %27, %31, %35 in 0 : vector<4x512xf32>, vector<4x512xf32>, vector<4x512xf32>, vector<4x512xf32>, vector<4x512xf32>, vector<4x512xf32>, vector<4x512xf32>, vector<4x512xf32>, vector<4x512xf32> -> vector<36x512xf32>
    %cst = arith.constant dense<0.000000e+00> : vector<8x512xf32>
    %37 = tpu.matmul %3, %36, %cst {dimension_numbers = #tpu.dot_dimension_numbers<[1], [0], [0], [1], [0, 0, 1, 1], [], []>} : vector<8x36xf32>, vector<36x512xf32>, vector<8x512xf32> -> vector<8x512xf32>
    %c0_7 = arith.constant 0 : index
    %c0_8 = arith.constant 0 : index
    %38 = vector.load %arg5[%c0_7, %c0_8] : memref<512x128xf32, #tpu.memory_space<vmem>>, vector<512x128xf32>
    %cst_9 = arith.constant dense<0.000000e+00> : vector<8x128xf32>
    %39 = tpu.matmul %37, %38, %cst_9 {dimension_numbers = #tpu.dot_dimension_numbers<[1], [0], [0], [1], [0, 0, 1, 1], [], []>} : vector<8x512xf32>, vector<512x128xf32>, vector<8x128xf32> -> vector<8x128xf32>
    %c0_10 = arith.constant 0 : index
    %c0_11 = arith.constant 0 : index
    %40 = vector.load %arg4[%c0_10, %c0_11] : memref<8x1xf32, #tpu.memory_space<vmem>>, vector<8x1xf32>
    %41 = vector.broadcast %40 : vector<8x1xf32> to vector<8x128xf32>
    %42 = arith.addf %39, %41 : vector<8x128xf32>
    %cst_12 = arith.constant 0.000000e+00 : f32
    %43 = vector.broadcast %cst_12 : f32 to vector<8x128xf32>
    %44 = arith.maximumf %42, %43 : vector<8x128xf32>
    %c0_13 = arith.constant 0 : index
    %c0_14 = arith.constant 0 : index
    %45 = vector.load %arg6[%c0_13, %c0_14] : memref<16x72xf32, #tpu.memory_space<vmem>>, vector<16x72xf32>
    %c9_i32 = arith.constant 9 : i32
    %46 = tpu.dynamic_rotate %44 by %c9_i32 dim 1 : vector<8x128xf32>, i32 -> vector<8x128xf32>
    %47 = vector.extract_strided_slice %2 {offsets = [0, 0], sizes = [1, 128], strides = [1, 1]} : vector<9x128xf32> to vector<1x128xf32>
    %48 = vector.broadcast %47 : vector<1x128xf32> to vector<8x128xf32>
    %49 = arith.mulf %46, %48 : vector<8x128xf32>
    %c8_i32 = arith.constant 8 : i32
    %50 = tpu.dynamic_rotate %44 by %c8_i32 dim 1 : vector<8x128xf32>, i32 -> vector<8x128xf32>
    %51 = vector.extract_strided_slice %2 {offsets = [1, 0], sizes = [1, 128], strides = [1, 1]} : vector<9x128xf32> to vector<1x128xf32>
    %52 = vector.broadcast %51 : vector<1x128xf32> to vector<8x128xf32>
    %53 = arith.mulf %50, %52 : vector<8x128xf32>
    %c7_i32 = arith.constant 7 : i32
    %54 = tpu.dynamic_rotate %44 by %c7_i32 dim 1 : vector<8x128xf32>, i32 -> vector<8x128xf32>
    %55 = vector.extract_strided_slice %2 {offsets = [2, 0], sizes = [1, 128], strides = [1, 1]} : vector<9x128xf32> to vector<1x128xf32>
    %56 = vector.broadcast %55 : vector<1x128xf32> to vector<8x128xf32>
    %57 = arith.mulf %54, %56 : vector<8x128xf32>
    %c1_i32_15 = arith.constant 1 : i32
    %58 = tpu.dynamic_rotate %44 by %c1_i32_15 dim 1 : vector<8x128xf32>, i32 -> vector<8x128xf32>
    %59 = vector.extract_strided_slice %2 {offsets = [3, 0], sizes = [1, 128], strides = [1, 1]} : vector<9x128xf32> to vector<1x128xf32>
    %60 = vector.broadcast %59 : vector<1x128xf32> to vector<8x128xf32>
    %61 = arith.mulf %58, %60 : vector<8x128xf32>
    %c127_i32 = arith.constant 127 : i32
    %62 = tpu.dynamic_rotate %44 by %c127_i32 dim 1 : vector<8x128xf32>, i32 -> vector<8x128xf32>
    %63 = vector.extract_strided_slice %2 {offsets = [5, 0], sizes = [1, 128], strides = [1, 1]} : vector<9x128xf32> to vector<1x128xf32>
    %64 = vector.broadcast %63 : vector<1x128xf32> to vector<8x128xf32>
    %65 = arith.mulf %62, %64 : vector<8x128xf32>
    %c121_i32 = arith.constant 121 : i32
    %66 = tpu.dynamic_rotate %44 by %c121_i32 dim 1 : vector<8x128xf32>, i32 -> vector<8x128xf32>
    %67 = vector.extract_strided_slice %2 {offsets = [6, 0], sizes = [1, 128], strides = [1, 1]} : vector<9x128xf32> to vector<1x128xf32>
    %68 = vector.broadcast %67 : vector<1x128xf32> to vector<8x128xf32>
    %69 = arith.mulf %66, %68 : vector<8x128xf32>
    %c120_i32 = arith.constant 120 : i32
    %70 = tpu.dynamic_rotate %44 by %c120_i32 dim 1 : vector<8x128xf32>, i32 -> vector<8x128xf32>
    %71 = vector.extract_strided_slice %2 {offsets = [7, 0], sizes = [1, 128], strides = [1, 1]} : vector<9x128xf32> to vector<1x128xf32>
    %72 = vector.broadcast %71 : vector<1x128xf32> to vector<8x128xf32>
    %73 = arith.mulf %70, %72 : vector<8x128xf32>
    %c119_i32 = arith.constant 119 : i32
    %74 = tpu.dynamic_rotate %44 by %c119_i32 dim 1 : vector<8x128xf32>, i32 -> vector<8x128xf32>
    %75 = vector.extract_strided_slice %2 {offsets = [8, 0], sizes = [1, 128], strides = [1, 1]} : vector<9x128xf32> to vector<1x128xf32>
    %76 = vector.broadcast %75 : vector<1x128xf32> to vector<8x128xf32>
    %77 = arith.mulf %74, %76 : vector<8x128xf32>
    %78 = tpu.concatenate %49, %53, %57, %61, %44, %65, %69, %73, %77 in 0 : vector<8x128xf32>, vector<8x128xf32>, vector<8x128xf32>, vector<8x128xf32>, vector<8x128xf32>, vector<8x128xf32>, vector<8x128xf32>, vector<8x128xf32>, vector<8x128xf32> -> vector<72x128xf32>
    %cst_16 = arith.constant dense<0.000000e+00> : vector<16x128xf32>
    %79 = tpu.matmul %45, %78, %cst_16 {dimension_numbers = #tpu.dot_dimension_numbers<[1], [0], [0], [1], [0, 0, 1, 1], [], []>} : vector<16x72xf32>, vector<72x128xf32>, vector<16x128xf32> -> vector<16x128xf32>
    %c0_17 = arith.constant 0 : index
    %c0_18 = arith.constant 0 : index
    %80 = vector.load %arg7[%c0_17, %c0_18] : memref<16x1xf32, #tpu.memory_space<vmem>>, vector<16x1xf32>
    %81 = vector.broadcast %80 : vector<16x1xf32> to vector<16x128xf32>
    %82 = arith.addf %79, %81 : vector<16x128xf32>
    %cst_19 = arith.constant 0.000000e+00 : f32
    %83 = vector.broadcast %cst_19 : f32 to vector<16x128xf32>
    %84 = arith.maximumf %82, %83 : vector<16x128xf32>
    %c0_20 = arith.constant 0 : index
    %c0_21 = arith.constant 0 : index
    %85 = vector.load %arg8[%c0_20, %c0_21] : memref<128x512xf32, #tpu.memory_space<vmem>>, vector<128x512xf32>
    %cst_22 = arith.constant dense<0.000000e+00> : vector<16x512xf32>
    %86 = tpu.matmul %84, %85, %cst_22 {dimension_numbers = #tpu.dot_dimension_numbers<[1], [0], [0], [1], [0, 0, 1, 1], [], []>} : vector<16x128xf32>, vector<128x512xf32>, vector<16x512xf32> -> vector<16x512xf32>
    %c0_23 = arith.constant 0 : index
    %c0_24 = arith.constant 0 : index
    %87 = vector.load %arg9[%c0_23, %c0_24] : memref<8x144xf32, #tpu.memory_space<vmem>>, vector<8x144xf32>
    %c17_i32_25 = arith.constant 17 : i32
    %88 = tpu.dynamic_rotate %86 by %c17_i32_25 dim 1 : vector<16x512xf32>, i32 -> vector<16x512xf32>
    %89 = vector.extract_strided_slice %1 {offsets = [0, 0], sizes = [1, 512], strides = [1, 1]} : vector<9x512xf32> to vector<1x512xf32>
    %90 = vector.broadcast %89 : vector<1x512xf32> to vector<16x512xf32>
    %91 = arith.mulf %88, %90 : vector<16x512xf32>
    %c16_i32_26 = arith.constant 16 : i32
    %92 = tpu.dynamic_rotate %86 by %c16_i32_26 dim 1 : vector<16x512xf32>, i32 -> vector<16x512xf32>
    %93 = vector.extract_strided_slice %1 {offsets = [1, 0], sizes = [1, 512], strides = [1, 1]} : vector<9x512xf32> to vector<1x512xf32>
    %94 = vector.broadcast %93 : vector<1x512xf32> to vector<16x512xf32>
    %95 = arith.mulf %92, %94 : vector<16x512xf32>
    %c15_i32_27 = arith.constant 15 : i32
    %96 = tpu.dynamic_rotate %86 by %c15_i32_27 dim 1 : vector<16x512xf32>, i32 -> vector<16x512xf32>
    %97 = vector.extract_strided_slice %1 {offsets = [2, 0], sizes = [1, 512], strides = [1, 1]} : vector<9x512xf32> to vector<1x512xf32>
    %98 = vector.broadcast %97 : vector<1x512xf32> to vector<16x512xf32>
    %99 = arith.mulf %96, %98 : vector<16x512xf32>
    %c1_i32_28 = arith.constant 1 : i32
    %100 = tpu.dynamic_rotate %86 by %c1_i32_28 dim 1 : vector<16x512xf32>, i32 -> vector<16x512xf32>
    %101 = vector.extract_strided_slice %1 {offsets = [3, 0], sizes = [1, 512], strides = [1, 1]} : vector<9x512xf32> to vector<1x512xf32>
    %102 = vector.broadcast %101 : vector<1x512xf32> to vector<16x512xf32>
    %103 = arith.mulf %100, %102 : vector<16x512xf32>
    %c511_i32_29 = arith.constant 511 : i32
    %104 = tpu.dynamic_rotate %86 by %c511_i32_29 dim 1 : vector<16x512xf32>, i32 -> vector<16x512xf32>
    %105 = vector.extract_strided_slice %1 {offsets = [5, 0], sizes = [1, 512], strides = [1, 1]} : vector<9x512xf32> to vector<1x512xf32>
    %106 = vector.broadcast %105 : vector<1x512xf32> to vector<16x512xf32>
    %107 = arith.mulf %104, %106 : vector<16x512xf32>
    %c497_i32_30 = arith.constant 497 : i32
    %108 = tpu.dynamic_rotate %86 by %c497_i32_30 dim 1 : vector<16x512xf32>, i32 -> vector<16x512xf32>
    %109 = vector.extract_strided_slice %1 {offsets = [6, 0], sizes = [1, 512], strides = [1, 1]} : vector<9x512xf32> to vector<1x512xf32>
    %110 = vector.broadcast %109 : vector<1x512xf32> to vector<16x512xf32>
    %111 = arith.mulf %108, %110 : vector<16x512xf32>
    %c496_i32_31 = arith.constant 496 : i32
    %112 = tpu.dynamic_rotate %86 by %c496_i32_31 dim 1 : vector<16x512xf32>, i32 -> vector<16x512xf32>
    %113 = vector.extract_strided_slice %1 {offsets = [7, 0], sizes = [1, 512], strides = [1, 1]} : vector<9x512xf32> to vector<1x512xf32>
    %114 = vector.broadcast %113 : vector<1x512xf32> to vector<16x512xf32>
    %115 = arith.mulf %112, %114 : vector<16x512xf32>
    %c495_i32_32 = arith.constant 495 : i32
    %116 = tpu.dynamic_rotate %86 by %c495_i32_32 dim 1 : vector<16x512xf32>, i32 -> vector<16x512xf32>
    %117 = vector.extract_strided_slice %1 {offsets = [8, 0], sizes = [1, 512], strides = [1, 1]} : vector<9x512xf32> to vector<1x512xf32>
    %118 = vector.broadcast %117 : vector<1x512xf32> to vector<16x512xf32>
    %119 = arith.mulf %116, %118 : vector<16x512xf32>
    %120 = tpu.concatenate %91, %95, %99, %103, %86, %107, %111, %115, %119 in 0 : vector<16x512xf32>, vector<16x512xf32>, vector<16x512xf32>, vector<16x512xf32>, vector<16x512xf32>, vector<16x512xf32>, vector<16x512xf32>, vector<16x512xf32>, vector<16x512xf32> -> vector<144x512xf32>
    %cst_33 = arith.constant dense<0.000000e+00> : vector<8x512xf32>
    %121 = tpu.matmul %87, %120, %cst_33 {dimension_numbers = #tpu.dot_dimension_numbers<[1], [0], [0], [1], [0, 0, 1, 1], [], []>} : vector<8x144xf32>, vector<144x512xf32>, vector<8x512xf32> -> vector<8x512xf32>
    %c0_34 = arith.constant 0 : index
    %c0_35 = arith.constant 0 : index
    %122 = vector.load %arg10[%c0_34, %c0_35] : memref<8x1xf32, #tpu.memory_space<vmem>>, vector<8x1xf32>
    %123 = vector.broadcast %122 : vector<8x1xf32> to vector<8x512xf32>
    %124 = arith.addf %121, %123 : vector<8x512xf32>
    %cst_36 = arith.constant 0.000000e+00 : f32
    %125 = vector.broadcast %cst_36 : f32 to vector<8x512xf32>
    %126 = arith.maximumf %124, %125 : vector<8x512xf32>
    %c0_37 = arith.constant 0 : index
    %c0_38 = arith.constant 0 : index
    %127 = vector.load %arg11[%c0_37, %c0_38] : memref<3x8xf32, #tpu.memory_space<vmem>>, vector<3x8xf32>
    %cst_39 = arith.constant dense<0.000000e+00> : vector<3x512xf32>
    %128 = tpu.matmul %127, %126, %cst_39 {dimension_numbers = #tpu.dot_dimension_numbers<[1], [0], [0], [1], [0, 0, 1, 1], [], []>} : vector<3x8xf32>, vector<8x512xf32>, vector<3x512xf32> -> vector<3x512xf32>
    %c0_40 = arith.constant 0 : index
    %c0_41 = arith.constant 0 : index
    %129 = vector.load %arg12[%c0_40, %c0_41] : memref<3x1xf32, #tpu.memory_space<vmem>>, vector<3x1xf32>
    %130 = vector.broadcast %129 : vector<3x1xf32> to vector<3x512xf32>
    %131 = arith.addf %128, %130 : vector<3x512xf32>
    %c0_42 = arith.constant 0 : index
    %c0_43 = arith.constant 0 : index
    %132 = vector.load %arg13[%c0_42, %c0_43] : memref<3x512xf32, #tpu.memory_space<vmem>>, vector<3x512xf32>
    tpu.vector_store %arg13[%c0_42, %c0_43], %131 {strides = array<i32>} : memref<3x512xf32, #tpu.memory_space<vmem>>, vector<3x512xf32>,
    return
  }
}

</mosaic_0001>

<bundles_post_ra>
// kernel: model_forward.1
= control target key start
LH: loop header
LB: loop body
LE: loop exit
PB: predicated region body
PF: predicated region fallthrough
CT: control target
= control target key end

     0   :  { %18 = vsyncpa [#allocation3], 0  ;;  %s2657_s0 = inlined_call_operand.vmem [shape: f32[4,512], index: 0, kind: input, shape index: {}]   ;;  %s2658_s1 = inlined_call_operand.vmem [shape: f32[9,512], index: 1, kind: input, shape index: {}]   ;;  %s2659_s2 = inlined_call_operand.vmem [shape: f32[9,128], index: 2, kind: input, shape index: {}]   ;;  %s2660_s3 = inlined_call_operand.vmem [shape: f32[8,36], index: 3, kind: input, shape index: {}]   ;;  %s2661_s4 = inlined_call_operand.vmem [shape: f32[8,1], index: 4, kind: input, shape index: {}]   ;;  %s2662_s5 = inlined_call_operand.hbm [shape: f32[512,128], index: 5, kind: input, shape index: {}]   ;;  %s2663_s6 = inlined_call_operand.vmem [shape: f32[16,72], index: 6, kind: input, shape index: {}]   ;;  %s2664_s7 = inlined_call_operand.vmem [shape: f32[16,1], index: 7, kind: input, shape index: {}]   ;;  %s2665_s8 = inlined_call_operand.hbm [shape: f32[128,512], index: 8, kind: input, shape index: {}]   ;;  %s2666_s9 = inlined_call_operand.vmem [shape: f32[8,144], index: 9, kind: input, shape index: {}]   ;;  %s2667_s10 = inlined_call_operand.vmem [shape: f32[8,1], index: 10, kind: input, shape index: {}]   ;;  %s2668_s11 = inlined_call_operand.vmem [shape: f32[3,8], index: 11, kind: input, shape index: {}]   ;;  %s2669_s12 = inlined_call_operand.vmem [shape: f32[3,1], index: 12, kind: input, shape index: {}]   ;;  %s2670_s13 = inlined_call_operand.vmem [shape: f32[3,512], index: 13, kind: output, shape index: {}]  }
   0x1   :  { %s34_s27 = sshll.u32 %s2662_s5, 4  ;;  %s35_s27 = int_to_ptr.hbm [resolvable:$true] %s34_s27 }
   0x2   :  { %19 = vsyncpa [#allocation5], 0  ;;  %s1549_s28 = smov [#allocation2]   ;;  %s51_s15 = sshll.u32 %s2665_s8, 4  ;;  %s52_s15 = int_to_ptr.hbm [resolvable:$true] %s51_s15 }
   0x3   :  { %s36_s29 = sshll.u32 %s1549_s28, 4  ;;  %s1550_s16 = smov 128   ;;  %s37_s29 = int_to_ptr.vmem [resolvable:$true] %s36_s29 }
   0x4   :  { %s1551_s17 = smov 8   ;;  %s1552_s18 = smov [#allocation4]  }
   0x5   :  { %42 = dma.hbm_to_vmem [thread:$0]  %s35_s27, 8192, %s37_s29, [#allocation3], %s1550_s16, %s1550_s16, %s1551_s17  }
   0x6   :  { %s53_s19 = sshll.u32 %s1552_s18, 4  ;;  %s1553_s20 = smov 512   ;;  %s54_s19 = int_to_ptr.vmem [resolvable:$true] %s53_s19 }
   0x7   :  { %s1554_s21 = smov 32  }
   0x8   :  { %59 = dma.hbm_to_vmem [thread:$0]  %s52_s15, 8192, %s54_s19, [#allocation5], %s1553_s20, %s1553_s20, %s1554_s21  }
   0x9   :  { %1545 = dma.done.wait [#allocation3], 8192  }
   0xa   :  { %1546 = vsyncadd [#allocation3], 4294959104 }
   0xb   :  { %1547 = dma.done.wait [#allocation5], 8192  }
   0xc   :  { %1548 = vsyncadd [#allocation5], 4294959104  ;;  %v1649_v0 = vld [vmem:[%s2657_s0] sm:$0xff]  ;;  %v1654_v1 = vld [vmem:[%s2657_s0 + $0x8] sm:$0xff]  ;;  %s1555_s24 = smov 17   ;;  %s1556_s0 = smov 16   ;;  %v110_v53 = vlaneseq }
   0xd   :  { %91 = vst [vmem:[#allocation1] ss:$2 sm:$0xff] %v1649_v0  ;;  %s1557_s25 = smov 15   ;;  %s1558_s26 = smov 1   ;;  %v1760_v57 = vld [vmem:[%s2658_s1 + $0x10] sm:$0xff]  ;;  %v79_v60 = vld [vmem:[%s2658_s1 + $0x8] sm:$0xff] }
   0xe   :  { %93 = vst [vmem:[#allocation1 + $0x10] ss:$2 sm:$0xff] %v1654_v1  ;;  %s1559_s27 = smov 127   ;;  %s1560_s28 = smov 113   ;;  %v1755_v56 = vand.u32 127, %v110_v53  ;;  %v1772_v61 = vperm.slane %v79_v60, 0 }
   0xf   :  { %s1561_s29 = smov 112   ;;  %s1562_s30 = smov 111   ;;  %v1488_v59 = vld [vmem:[%s2658_s1 + $0x28] ss:$0 sm:$0xff]  ;;  %v1778_v63 = vperm.slane %v1760_v57, 1  ;;  %vm408_vm6 = vcmask 1043456  }
  0x10   :  { %vm336_vm0 = vcmp.lt.s32.totalorder %v1755_v56, 111  ;;  %vm112_vm1 = vcmp.lt.s32.totalorder %v1755_v56, 17  ;;  %2716 = vst [vmem:[#allocation8_spill] sm:$0xff] %v1772_v61  ;;  %vm144_vm2 = vcmp.lt.s32.totalorder %v1755_v56, 16  ;;  %vm240_vm3 = vcmp.lt.s32.totalorder %v1755_v56, 127  ;;  %v550_v53 = vld [vmem:[#allocation2 + $0xe8] sm:$0xff] }
  0x11   :  { %2717 = vst [vmem:[#allocation9_spill] sm:$0xff] %v1778_v63  ;;  %vm208_vm4 = vcmp.lt.s32.totalorder %v1755_v56, 1  ;;  %vm176_vm5 = vcmp.lt.s32.totalorder %v1755_v56, 15  ;;  %vm272_vm7 = vcmp.lt.s32.totalorder %v1755_v56, 113  ;;  %vm304_vm8 = vcmp.lt.s32.totalorder %v1755_v56, 112  ;;  %s1565_s22 = smov 120  }
  0x12   :  { %vm425_vm9 = vcmask 293888   ;;  %s1566_s8 = smov 119   ;;  %s1567_s23 = smov 7   ;;  %vm718_vm10 = vcmask 588800   ;;  %vm1170_vm11 = vcmask 130048   ;;  %vm1345_vm12 = vcmask 64512  }
  0x13   :  { %s1568_s16 = smov 9  }
  0x14   :  { %v95_v2 = vld.sshfl [vmem:[#allocation1 + $0x8] sm:$0xff pattern:$0x75316420]  ;;  %v94_v3 = vld.sshfl [vmem:[#allocation1] sm:$0xff pattern:$0x75316420] }
  0x15   :  { %104 = vrot.lane.b32.xlu2 %v95_v2, %s1555_s24  ;;  %102 = vrot.lane.b32.xlu1 %v94_v3, %s1555_s24  ;;  %125 = vst [vmem:[#allocation1] ss:$2 sm:$0xff] %v1649_v0  ;;  %v1661_v4 = vld.sshfl [vmem:[#allocation1 + $0x10] sm:$0xff pattern:$0x75316420] }
  0x16   :  { %v1663_v5 = vld.sshfl [vmem:[#allocation1 + $0x18] sm:$0xff pattern:$0x75316420] }
  0x17   :  { %127 = vst [vmem:[#allocation1 + $0x10] ss:$2 sm:$0xff] %v1654_v1 }
  0x1c   :  { %v129_v6 = vld.sshfl [vmem:[#allocation1 + $0x8] sm:$0xff pattern:$0x75316420]  ;;  %v128_v7 = vld.sshfl [vmem:[#allocation1] sm:$0xff pattern:$0x75316420] }
  0x1d   :  { %138 = vrot.lane.b32.xlu2 %v129_v6, %s1556_s0  ;;  %136 = vrot.lane.b32.xlu1 %v128_v7, %s1556_s0  ;;  %157 = vst [vmem:[#allocation1] ss:$2 sm:$0xff] %v1649_v0  ;;  %v1798_v6 = vperm.slane %v79_v60, 2  ;;  %v1801_v7 = vperm.slane %v1760_v57, 2 }
  0x1e   :  { %v130_v8 = vld.sshfl [vmem:[#allocation1 + $0x10] sm:$0xff pattern:$0x75316420]  ;;  %v1669_v9 = vld.sshfl [vmem:[#allocation1 + $0x18] sm:$0xff pattern:$0x75316420] }
  0x1f   :  { %159 = vst [vmem:[#allocation1 + $0x10] ss:$2 sm:$0xff] %v1654_v1 }
  0x20   :  { %2719 = vst [vmem:[#allocation11_spill] sm:$0xff] %v1798_v6 }
  0x21   :  { %2720 = vst [vmem:[#allocation12_spill] sm:$0xff] %v1801_v7 }
  0x24   :  { %v160_v10 = vld.sshfl [vmem:[#allocation1] sm:$0xff pattern:$0x75316420]  ;;  %v161_v11 = vld.sshfl [vmem:[#allocation1 + $0x8] sm:$0xff pattern:$0x75316420] }
  0x25   :  { %140 = vrot.lane.b32.xlu1 %v130_v8, %s1556_s0  ;;  %168 = vrot.lane.b32.xlu0 %v160_v10, %s1557_s25  ;;  %189 = vst [vmem:[#allocation1] ss:$2 sm:$0xff] %v1649_v0  ;;  %v1803_v8 = vperm.slane %v79_v60, 3  ;;  %v1808_v10 = vperm.slane %v79_v60, 7 }
  0x26   :  { %v162_v12 = vld.sshfl [vmem:[#allocation1 + $0x10] sm:$0xff pattern:$0x75316420]  ;;  %v163_v13 = vld.sshfl [vmem:[#allocation1 + $0x18] sm:$0xff pattern:$0x75316420] }
  0x27   :  { %191 = vst [vmem:[#allocation1 + $0x10] ss:$2 sm:$0xff] %v1654_v1  ;;  %172 = vrot.lane.b32.xlu2 %v162_v12, %s1557_s25 }
  0x2c   :  { %v193_v14 = vld.sshfl [vmem:[#allocation1 + $0x8] sm:$0xff pattern:$0x75316420]  ;;  %v192_v15 = vld.sshfl [vmem:[#allocation1] sm:$0xff pattern:$0x75316420] }
  0x2d   :  { %170 = vrot.lane.b32.xlu1 %v161_v11, %s1557_s25  ;;  %202 = vrot.lane.b32.xlu0 %v193_v14, %s1558_s26  ;;  %221 = vst [vmem:[#allocation1] ss:$2 sm:$0xff] %v1649_v0 }
  0x2e   :  { %v194_v16 = vld.sshfl [vmem:[#allocation1 + $0x10] sm:$0xff pattern:$0x75316420]  ;;  %v195_v17 = vld.sshfl [vmem:[#allocation1 + $0x18] sm:$0xff pattern:$0x75316420] }
  0x2f   :  { %200 = vrot.lane.b32.xlu2 %v192_v15, %s1558_s26  ;;  %223 = vst [vmem:[#allocation1 + $0x10] ss:$2 sm:$0xff] %v1654_v1  ;;  %v1823_v15 = vld [vmem:[%s2658_s1] sm:$0xff] }
  0x34   :  { %v225_v18 = vld.sshfl [vmem:[#allocation1 + $0x8] sm:$0xff pattern:$0x75316420]  ;;  %v224_v19 = vld.sshfl [vmem:[#allocation1] sm:$0xff pattern:$0x75316420] }
  0x35   :  { %204 = vrot.lane.b32.xlu1 %v194_v16, %s1558_s26  ;;  %206 = vrot.lane.b32.xlu0 %v195_v17, %s1558_s26  ;;  %253 = vst [vmem:[#allocation1] ss:$2 sm:$0xff] %v1649_v0  ;;  %v1826_v16 = vperm.slane %v1823_v15, 5  ;;  %v1829_v17 = vperm.slane %v79_v60, 6 }
  0x36   :  { %v226_v20 = vld.sshfl [vmem:[#allocation1 + $0x10] sm:$0xff pattern:$0x75316420]  ;;  %v227_v21 = vld.sshfl [vmem:[#allocation1 + $0x18] sm:$0xff pattern:$0x75316420] }
  0x37   :  { %255 = vst [vmem:[#allocation1 + $0x10] ss:$2 sm:$0xff] %v1654_v1  ;;  %234 = vrot.lane.b32.xlu2 %v225_v18, %s1559_s27 }
  0x3c   :  { %v257_v22 = vld.sshfl [vmem:[#allocation1 + $0x8] sm:$0xff pattern:$0x75316420]  ;;  %v256_v23 = vld.sshfl [vmem:[#allocation1] sm:$0xff pattern:$0x75316420] }
  0x3d   :  { %238 = vrot.lane.b32.xlu0 %v227_v21, %s1559_s27  ;;  %285 = vst [vmem:[#allocation1] ss:$2 sm:$0xff] %v1649_v0 }
  0x3e   :  { %v258_v24 = vld.sshfl [vmem:[#allocation1 + $0x10] sm:$0xff pattern:$0x75316420]  ;;  %v259_v25 = vld.sshfl [vmem:[#allocation1 + $0x18] sm:$0xff pattern:$0x75316420] }
  0x3f   :  { %268 = vrot.lane.b32.xlu1 %v258_v24, %s1560_s28  ;;  %236 = vrot.lane.b32.xlu2 %v226_v20, %s1559_s27  ;;  %287 = vst [vmem:[#allocation1 + $0x10] ss:$2 sm:$0xff] %v1654_v1  ;;  %v552_v20 = vld [vmem:[#allocation2 + $0xf8] sm:$0xff] }
  0x40   :  { %611 = vmatpush.msra.mxu1 %v552_v20  ;;  %v1489_v20 = vld [vmem:[%s2658_s1 + $0x30] ss:$0 sm:$0xff] }
  0x44   :  { %v288_v26 = vld.sshfl [vmem:[#allocation1] sm:$0xff pattern:$0x75316420]  ;;  %v289_v27 = vld.sshfl [vmem:[#allocation1 + $0x8] sm:$0xff pattern:$0x75316420] }
  0x45   :  { %266 = vrot.lane.b32.xlu0 %v257_v22, %s1560_s28  ;;  %317 = vst [vmem:[#allocation1] ss:$2 sm:$0xff] %v1649_v0 }
  0x46   :  { %v290_v28 = vld.sshfl [vmem:[#allocation1 + $0x10] sm:$0xff pattern:$0x75316420]  ;;  %v291_v29 = vld.sshfl [vmem:[#allocation1 + $0x18] sm:$0xff pattern:$0x75316420] }
  0x47   :  { %270 = vrot.lane.b32.xlu1 %v259_v25, %s1560_s28  ;;  %232 = vrot.lane.b32.xlu2 %v224_v19, %s1559_s27  ;;  %319 = vst [vmem:[#allocation1 + $0x10] ss:$2 sm:$0xff] %v1654_v1  ;;  %v1832_v19 = vperm.slane %v1760_v57, 0  ;;  %v551_v25 = vld [vmem:[#allocation2 + $0xf0] sm:$0xff] }
  0x48   :  { %612 = vmatpush.msra.mxu1 %v551_v25 }
  0x49   :  { %2721 = vst [vmem:[#allocation13_spill] sm:$0xff] %v1832_v19 }
  0x4a   :  { %613 = vmatpush.msra.mxu1 %v550_v53 }
  0x4c   :  { %v321_v30 = vld.sshfl [vmem:[#allocation1 + $0x8] sm:$0xff pattern:$0x75316420]  ;;  %v320_v31 = vld.sshfl [vmem:[#allocation1] sm:$0xff pattern:$0x75316420] }
  0x4d   :  { %264 = vrot.lane.b32.xlu0 %v256_v23, %s1560_s28  ;;  %373 = vst [vmem:[#allocation1] ss:$2 sm:$0xff] %v1649_v0  ;;  %v1781_v0 = vperm.slane %v79_v60, 5  ;;  %v1843_v23 = vperm.slane %v1760_v57, 7 }
  0x4e   :  { %v322_v32 = vld.sshfl [vmem:[#allocation1 + $0x10] sm:$0xff pattern:$0x75316420]  ;;  %v323_v33 = vld.sshfl [vmem:[#allocation1 + $0x18] sm:$0xff pattern:$0x75316420] }
  0x4f   :  { %302 = vrot.lane.b32.xlu2 %v291_v29, %s1561_s29  ;;  %330 = vrot.lane.b32.xlu1 %v321_v30, %s1562_s30  ;;  %375 = vst [vmem:[#allocation1 + $0x10] ss:$2 sm:$0xff] %v1654_v1 }
  0x55   :  { %298 = vrot.lane.b32.xlu0 %v289_v27, %s1561_s29 }
  0x57   :  { %296 = vrot.lane.b32.xlu2 %v288_v26, %s1561_s29  ;;  %332 = vrot.lane.b32.xlu1 %v322_v32, %s1562_s30 }
  0x5d   :  { %300 = vrot.lane.b32.xlu0 %v290_v28, %s1561_s29 }
  0x5f   :  { %142 = vrot.lane.b32.xlu2 %v1669_v9, %s1556_s0  ;;  %106 = vrot.lane.b32.xlu1 %v1661_v4, %s1555_s24 }
  0x65   :  { %334 = vrot.lane.b32.xlu0 %v323_v33, %s1562_s30  ;;  %v1859_v33 = vperm.slane %v1760_v57, 5 }
  0x67   :  { %108 = vrot.lane.b32.xlu1 %v1663_v5, %s1555_s24  ;;  %v1795_v5 = vperm.slane %v79_v60, 1 }
  0x69   :  { %2718 = vst [vmem:[#allocation10_spill] sm:$0xff] %v1795_v5 }
  0x6d   :  { %328 = vrot.lane.b32.xlu0 %v320_v31, %s1562_s30 }
  0x6f   :  { %v1715_v34 = vpop.permute.xlu2 %104 }
  0x75   :  { %174 = vrot.lane.b32.xlu0 %v163_v13, %s1557_s25 }
  0x77   :  { %v139_v37 = vpop.permute.xlu2 %138 }
  0x81   :  { %v1725_v40 = vpop.permute.xlu2 %172 }
  0x87   :  { %v1717_v35 = vpop.permute.xlu1 %102 }
  0x88   :  { %v115_v21 = vsel %vm112_vm1, %v1717_v35, %v1715_v34 }
  0x89   :  { %v1731_v43 = vpop.permute.xlu2 %200 }
  0x8f   :  { %v1719_v36 = vpop.permute.xlu1 %136 }
  0x90   :  { %v147_v11 = vsel %vm144_vm2, %v1719_v36, %v139_v37 }
  0x91   :  { %v1737_v46 = vpop.permute.xlu2 %234  ;;  %v1849_v26 = vmul.f32 %v1795_v5, %v147_v11 }
  0x97   :  { %v1721_v38 = vpop.permute.xlu1 %140  ;;  %v1723_v39 = vpop.permute.xlu0 %168 }
  0x98   :  { %v146_v2 = vsel %vm144_vm2, %v139_v37, %v1721_v38 }
  0x99   :  { %v1745_v50 = vpop.permute.xlu2 %236  ;;  %v155_v12 = vmul.f32 %v1778_v63, %v146_v2 }
  0x9a   :  { %v242_v3 = vsel %vm240_vm3, %v1737_v46, %v1745_v50 }
  0x9b   :  { %v250_v13 = vmul.f32 %v1781_v0, %v242_v3  ;;  %v355_v31 = vrot.slane %v155_v12, 4  ;;  %v122_v3 = vmul.f32 %v1772_v61, %v115_v21  ;;  %v377_v12 = vld.sshfl [vmem:[#allocation1 + $0x8] sm:$0xff pattern:$0x75316420] }
  0x9d   :  { %v389_v32 = vrot.slane %v250_v13, 4 }
  0x9f   :  { %v1727_v41 = vpop.permute.xlu1 %170  ;;  %v1729_v42 = vpop.permute.xlu0 %202 }
  0xa0   :  { %v211_v14 = vsel %vm208_vm4, %v1731_v43, %v1729_v42 }
  0xa1   :  { %v1753_v55 = vpop.permute.xlu2 %232  ;;  %v218_v27 = vmul.f32 %v1803_v8, %v211_v14 }
  0xa3   :  { %v366_v13 = vrot.slane %v218_v27, 4  ;;  %v1897_v27 = vperm.slane %v1760_v57, 6 }
  0xa7   :  { %v1733_v44 = vpop.permute.xlu1 %204  ;;  %v1735_v45 = vpop.permute.xlu0 %206 }
  0xa8   :  { %v210_v14 = vsel %vm208_vm4, %v1729_v42, %v1733_v44  ;;  %v548_v42 = vld [vmem:[#allocation2 + $0xd8] sm:$0xff] }
  0xa9   :  { %v1805_v9 = vpop.permute.xlu2 %302 }
  0xaf   :  { %v1739_v47 = vpop.permute.xlu0 %238 }
  0xb1   :  { %v1741_v48 = vpop.permute.xlu1 %268 }
  0xb7   :  { %v1743_v49 = vpop.permute.xlu0 %266 }
  0xb8   :  { %v274_v22 = vsel %vm272_vm7, %v1743_v49, %v1741_v48 }
  0xb9   :  { %v1747_v51 = vpop.permute.xlu1 %270  ;;  %v282_v60 = vmul.f32 %v1829_v17, %v274_v22  ;;  %v354_v22 = vrot.slane %v1849_v26, 4 }
  0xba   :  { %v273_v26 = vsel %vm272_vm7, %v1741_v48, %v1747_v51  ;;  %v547_v48 = vld [vmem:[#allocation2 + $0xd0] sm:$0xff] }
  0xbf   :  { %v1749_v52 = vpop.permute.xlu0 %264 }
  0xc1   :  { %v1751_v54 = vpop.permute.xlu1 %330 }
  0xc7   :  { %v1762_v58 = vpop.permute.xlu0 %298 }
  0xc9   :  { %v1775_v62 = vpop.permute.xlu1 %332 }
  0xca   :  { %v338_v1 = vsel %vm336_vm0, %v1751_v54, %v1775_v62 }
  0xcb   :  { %v346_v4 = vmul.f32 %v1488_v59, %v338_v1  ;;  %v241_v59 = vsel %vm240_vm3, %v1745_v50, %v1739_v47  ;;  %v549_v50 = vld [vmem:[#allocation2 + $0xe0] sm:$0xff] }
  0xcc   :  { %v251_v25 = vmul.f32 %v1859_v33, %v241_v59  ;;  %614 = vmatpush.msra.mxu1 %v549_v50  ;;  %v1913_v59 = vld [vmem:[%s2658_s1 + $0x18] sm:$0xff] }
  0xcd   :  { %1449 = vmatpush.msk.msra.mxu3 %vm408_vm6, %v346_v4  ;;  %v179_v4 = vsel %vm176_vm5, %v1723_v39, %v1727_v41 }
  0xce   :  { %615 = vmatpush.msra.mxu1 %v548_v42  ;;  %v390_v50 = vrot.slane %v251_v25, 4  ;;  %v378_v25 = vld.sshfl [vmem:[#allocation1 + $0x10] sm:$0xff pattern:$0x75316420] }
  0xcf   :  { %v301_v18 = vpop.permute.xlu0 %300 }
  0xd0   :  { %v306_v24 = vsel %vm304_vm8, %v1762_v58, %v301_v18  ;;  %v305_v28 = vsel %vm304_vm8, %v301_v18, %v1805_v9  ;;  %616 = vmatpush.msra.mxu1 %v547_v48  ;;  %v544_v48 = vld [vmem:[#allocation2 + $0xb8] sm:$0xff] }
  0xd1   :  { %v314_v29 = vmul.f32 %v1808_v10, %v306_v24  ;;  %v1856_v30 = vpop.permute.xlu1 %106  ;;  %v315_v11 = vmul.f32 %v1843_v23, %v305_v28  ;;  %v1893_v24 = vperm.slane %v1823_v15, 3  ;;  %v178_v28 = vsel %vm176_vm5, %v1727_v41, %v1725_v40 }
  0xd2   :  { %v114_v37 = vsel %vm112_vm1, %v1715_v34, %v1856_v30  ;;  %v1877_v34 = vperm.slane %v1760_v57, 3  ;;  %v418_v57 = vsel %vm408_vm6, %v377_v12, %v389_v32  ;;  %v1916_v41 = vperm.slane %v1823_v15, 7 }
  0xd3   :  { %v401_v1 = vrot.slane %v314_v29, 4  ;;  %v123_v2 = vmul.f32 %v1832_v19, %v114_v37  ;;  %v186_v29 = vmul.f32 %v1798_v6, %v179_v4  ;;  %v1922_v32 = vperm.slane %v1913_v59, 7 }
  0xd4   :  { %2722 = vst [vmem:[#allocation14_spill] sm:$0xff] %v1877_v34  ;;  %v219_v53 = vmul.f32 %v1877_v34, %v210_v14  ;;  %v1935_v14 = vld [vmem:[%s2660_s3] sm:$0xff] }
  0xd5   :  { %v422_v18 = vsel %vm408_vm6, %v282_v60, %v401_v1  ;;  %v1889_v21 = vsel %vm408_vm6, %v123_v2, %v355_v31  ;;  %v297_v31 = vpop.permute.xlu2 %296  ;;  %v402_v60 = vrot.slane %v315_v11, 4  ;;  %2723 = vst [vmem:[#allocation15_spill] sm:$0xff] %v1922_v32  ;;  %v414_v4 = vsel %vm408_vm6, %v186_v29, %v366_v13 }
  0xd6   :  { %473 = vmatpush.msra.mxu3 %v422_v18  ;;  %v307_v2 = vsel %vm304_vm8, %v297_v31, %v1762_v58  ;;  %v308_v11 = vsel %vm304_vm8, %v1805_v9, %v297_v31  ;;  %v546_v18 = vld [vmem:[#allocation2 + $0xc8] sm:$0xff]  ;;  %v187_v58 = vmul.f32 %v1801_v7, %v178_v28  ;;  %v243_v13 = vsel %vm240_vm3, %v1753_v55, %v1737_v46  ;;  %v545_v46 = vld [vmem:[#allocation2 + $0xc0] sm:$0xff] }
  0xd7   :  { %v335_v37 = vpop.permute.xlu0 %334  ;;  %v1943_v9 = vperm.slane %v1913_v59, 5  ;;  %v367_v42 = vrot.slane %v219_v53, 4  ;;  %v244_v29 = vsel %vm240_vm3, %v1739_v47, %v1753_v55  ;;  %v313_v28 = vmul.f32 %v1916_v41, %v307_v2  ;;  %617 = vmatpush.msra.mxu1 %v546_v18  ;;  %v1490_v47 = vld [vmem:[%s2658_s1 + $0x38] ss:$0 sm:$0xff]  ;;  %v1491_v55 = vld [vmem:[%s2658_s1 + $0x20] ss:$0 sm:$0xff] }
  0xd8   :  { %v337_v1 = vsel %vm336_vm0, %v1775_v62, %v335_v37  ;;  %474 = vmatpush.msra.mxu3 %v418_v57  ;;  %v283_v62 = vmul.f32 %v1897_v27, %v273_v26  ;;  %v1954_v26 = vperm.slane %v1913_v59, 3  ;;  %v316_v57 = vmul.f32 %v1922_v32, %v308_v11 }
  0xd9   :  { %v347_v12 = vmul.f32 %v1489_v20, %v337_v1  ;;  %2724 = vst [vmem:[#allocation16_spill] sm:$0xff] %v1943_v9  ;;  %v410_v20 = vsel %vm408_vm6, %v122_v3, %v354_v22  ;;  %v1958_v3 = vperm.slane %v1913_v59, 6  ;;  %v249_v22 = vmul.f32 %v1826_v16, %v243_v13  ;;  %618 = vmatpush.msra.mxu1 %v545_v46  ;;  %v109_v46 = vpop.permute.xlu1 %108 }
  0xda   :  { %475 = vmatpush.msra.mxu3 %v414_v4  ;;  %v423_v31 = vsel %vm408_vm6, %v283_v62, %v402_v60  ;;  %2725 = vst [vmem:[#allocation17_spill] sm:$0xff] %v1954_v26  ;;  %v1970_v53 = vperm.slane %v1823_v15, 6  ;;  %v276_v60 = vsel %vm272_vm7, %v1747_v51, %v1749_v52  ;;  %v419_v1 = vsel %vm408_vm6, %v378_v25, %v390_v50 }
  0xdb   :  { %1451 = vmatpush.msk.msra.mxu2 %vm408_vm6, %v347_v12  ;;  %2726 = vst [vmem:[#allocation18_spill] sm:$0xff] %v1958_v3  ;;  %v209_v2 = vsel %vm208_vm4, %v1733_v44, %v1735_v45  ;;  %v212_v4 = vsel %vm208_vm4, %v1735_v45, %v1731_v43  ;;  %v252_v12 = vmul.f32 %v1943_v9, %v244_v29  ;;  %v400_v11 = vrot.slane %v313_v28, 4  ;;  %v543_v43 = vld [vmem:[#allocation2 + $0xb0] sm:$0xff]  ;;  %v568_v28 = vld [vmem:[#allocation2 + $0x178] sm:$0xff] }
  0xdc   :  { %476 = vmatpush.msra.mxu3 %v410_v20  ;;  %v275_v51 = vsel %vm272_vm7, %v1749_v52, %v1743_v49  ;;  %v415_v18 = vsel %vm408_vm6, %v187_v58, %v367_v42  ;;  %619 = vmatpush.msra.mxu1 %v544_v48  ;;  %v403_v45 = vrot.slane %v316_v57, 4  ;;  %v284_v20 = vmul.f32 %v1958_v3, %v276_v60  ;;  %v376_v57 = vld.sshfl [vmem:[#allocation1] sm:$0xff pattern:$0x75316420]  ;;  %v567_v48 = vld [vmem:[#allocation2 + $0x170] sm:$0xff] }
  0xdd   :  { %493 = vmatpush.msra.mxu2 %v423_v31  ;;  %1450 = vmatmul.msk.f32.vlgmr.msra.gmra.mxu3 %vm425_vm9, %v1935_v14  ;;  %v143_v13 = vpop.permute.xlu2 %142  ;;  %v388_v52 = vrot.slane %v249_v22, 4  ;;  %v1998_v29 = vperm.slane %v1823_v15, 1  ;;  %v220_v58 = vmul.f32 %v1954_v26, %v209_v2  ;;  %v391_v42 = vrot.slane %v252_v12, 4  ;;  %v541_v12 = vld [vmem:[#allocation2 + $0xa0] sm:$0xff] }
  0xde   :  { %620 = vmatpush.msra.mxu1 %v543_v43  ;;  %v2004_v31 = vperm.slane %v1913_v59, 1  ;;  %v148_v22 = vsel %vm144_vm2, %v143_v13, %v1719_v36  ;;  %v2015_v60 = vperm.slane %v1823_v15, 0  ;;  %v2022_v2 = vperm.slane %v1913_v59, 0  ;;  %v540_v43 = vld [vmem:[#allocation2 + $0x98] sm:$0xff] }
  0xdf   :  { %494 = vmatpush.msra.mxu2 %v419_v1  ;;  %v329_v50 = vpop.permute.xlu0 %328  ;;  %2727 = vst [vmem:[#allocation19_spill] sm:$0xff] %v1998_v29  ;;  %v2026_v36 = vperm.slane %v1823_v15, 2  ;;  %v153_v15 = vmul.f32 %v1998_v29, %v148_v22  ;;  %v563_v22 = vld [vmem:[#allocation2 + $0x150] sm:$0xff] }
  0xe0   :  { %v339_v62 = vsel %vm336_vm0, %v329_v50, %v1751_v54  ;;  %v340_v44 = vsel %vm336_vm0, %v335_v37, %v329_v50  ;;  %v281_v54 = vmul.f32 %v1970_v53, %v275_v51  ;;  %v217_v37 = vmul.f32 %v1893_v24, %v212_v4  ;;  %2728 = vst [vmem:[#allocation20_spill] sm:$0xff] %v2004_v31 }
  0xe1   :  { %v348_v25 = vmul.f32 %v1490_v47, %v340_v44  ;;  %495 = vmatpush.msra.mxu2 %v415_v18  ;;  %v345_v49 = vmul.f32 %v1491_v55, %v339_v62  ;;  %v542_v47 = vld [vmem:[#allocation2 + $0xa8] sm:$0xff]  ;;  %v145_v55 = vsel %vm144_vm2, %v1721_v38, %v143_v13  ;;  %2729 = vst [vmem:[#allocation21_spill] sm:$0xff] %v2015_v60  ;;  %v2029_v4 = vperm.slane %v1913_v59, 2 }
  0xe2   :  { %v421_v1 = vsel %vm408_vm6, %v281_v54, %v400_v11  ;;  %2730 = vst [vmem:[#allocation22_spill] sm:$0xff] %v2022_v2  ;;  %v424_v38 = vsel %vm408_vm6, %v284_v20, %v403_v45  ;;  %v113_v51 = vsel %vm112_vm1, %v1856_v30, %v109_v46  ;;  %v116_v50 = vsel %vm112_vm1, %v109_v46, %v1717_v35  ;;  %v566_v62 = vld [vmem:[#allocation2 + $0x168] sm:$0xff]  ;;  %v565_v20 = vld [vmem:[#allocation2 + $0x160] sm:$0xff] }
  0xe3   :  { %1447 = vmatpush.msk.msra.mxu0 %vm408_vm6, %v345_v49  ;;  %496 = vmatpush.msra.mxu2 %v1889_v21  ;;  %v379_v21 = vld.sshfl [vmem:[#allocation1 + $0x18] sm:$0xff pattern:$0x75316420]  ;;  %2731 = vst [vmem:[#allocation23_spill] sm:$0xff] %v2026_v36  ;;  %v417_v11 = vsel %vm408_vm6, %v376_v57, %v388_v52  ;;  %v156_v59 = vmul.f32 %v2004_v31, %v145_v55  ;;  %v365_v30 = vrot.slane %v217_v37, 4  ;;  %v368_v45 = vrot.slane %v220_v58, 4 }
  0xe4   :  { %1453 = vmatpush.msk.msrb.mxu3 %vm408_vm6, %v348_v25  ;;  %1452 = vmatmul.msk.f32.vlgmr.msra.gmra.mxu2 %vm425_vm9, %v1935_v14  ;;  %2732 = vst [vmem:[#allocation24_spill] sm:$0xff] %v2029_v4  ;;  %v420_v18 = vsel %vm408_vm6, %v379_v21, %v391_v42  ;;  %v121_v25 = vmul.f32 %v2015_v60, %v116_v50  ;;  %v539_v37 = vld [vmem:[#allocation2 + $0x90] sm:$0xff]  ;;  %v584_v55 = vld [vmem:[#allocation2 + $0x1f8] sm:$0xff]  ;;  %v561_v50 = vld [vmem:[#allocation2 + $0x140] sm:$0xff] }
  0xe5   :  { %453 = vmatpush.msra.mxu0 %v421_v1  ;;  %631 = vmatpush.msrb.mxu2 %v568_v28  ;;  %v124_v49 = vmul.f32 %v2022_v2, %v113_v51  ;;  %v564_v28 = vld [vmem:[#allocation2 + $0x158] sm:$0xff]  ;;  %v356_v58 = vrot.slane %v156_v59, 4  ;;  %v538_v1 = vld [vmem:[#allocation2 + $0x88] sm:$0xff]  ;;  %v535_v21 = vld [vmem:[#allocation2 + $0x70] sm:$0xff] }
  0xe6   :  { %513 = vmatpush.msrb.mxu3 %v424_v38  ;;  %621 = vmatpush.msra.mxu1 %v542_v47  ;;  %v536_v47 = vld [vmem:[#allocation2 + $0x78] sm:$0xff]  ;;  %v562_v38 = vld [vmem:[#allocation2 + $0x148] sm:$0xff] }
  0xe7   :  { %v175_v44 = vpop.permute.xlu0 %174  ;;  %454 = vmatpush.msra.mxu0 %v417_v11  ;;  %632 = vmatpush.msrb.mxu2 %v567_v48  ;;  %v412_v57 = vsel %vm408_vm6, %v124_v49, %v356_v58  ;;  %v583_v48 = vld [vmem:[#allocation2 + $0x1f0] sm:$0xff]  ;;  %v582_v51 = vld [vmem:[#allocation2 + $0x1e8] sm:$0xff]  ;;  %v533_v11 = vld [vmem:[#allocation2 + $0x60] sm:$0xff] }
  0xe8   :  { %v177_v35 = vsel %vm176_vm5, %v1725_v40, %v175_v44  ;;  %v180_v13 = vsel %vm176_vm5, %v175_v44, %v1723_v39  ;;  %514 = vmatpush.msrb.mxu3 %v420_v18  ;;  %622 = vmatpush.msra.mxu1 %v541_v12  ;;  %v353_v40 = vrot.slane %v153_v15, 4  ;;  %v534_v12 = vld [vmem:[#allocation2 + $0x68] sm:$0xff]  ;;  %v560_v15 = vld [vmem:[#allocation2 + $0x138] sm:$0xff]  ;;  %v559_v44 = vld [vmem:[#allocation2 + $0x130] sm:$0xff] }
  0xe9   :  { %v185_v52 = vmul.f32 %v2026_v36, %v180_v13  ;;  %v188_v54 = vmul.f32 %v2029_v4, %v177_v35  ;;  %633 = vmatpush.msrb.mxu2 %v566_v62  ;;  %v581_v62 = vld [vmem:[#allocation2 + $0x1e0] sm:$0xff]  ;;  %v532_v59 = vld [vmem:[#allocation2 + $0x58] sm:$0xff]  ;;  %v531_v18 = vld [vmem:[#allocation2 + $0x50] sm:$0xff] }
  0xea   :  { %623 = vmatpush.msra.mxu1 %v540_v43  ;;  %v409_v46 = vsel %vm408_vm6, %v121_v25, %v353_v40  ;;  %v579_v43 = vld [vmem:[#allocation2 + $0x1d0] sm:$0xff]  ;;  %v578_v35 = vld [vmem:[#allocation2 + $0x1c8] sm:$0xff]  ;;  %v557_v13 = vld [vmem:[#allocation2 + $0x120] sm:$0xff] }
  0xeb   :  { %v413_v42 = vsel %vm408_vm6, %v185_v52, %v365_v30  ;;  %v416_v39 = vsel %vm408_vm6, %v188_v54, %v368_v45  ;;  %634 = vmatpush.msrb.mxu2 %v565_v20  ;;  %v558_v30 = vld [vmem:[#allocation2 + $0x128] sm:$0xff]  ;;  %v529_v20 = vld [vmem:[#allocation2 + $0x40] sm:$0xff]  ;;  %v556_v49 = vld [vmem:[#allocation2 + $0x118] sm:$0xff] }
  0xec   :  { %455 = vmatpush.msra.mxu0 %v413_v42  ;;  %515 = vmatpush.msrb.mxu3 %v416_v39  ;;  %v530_v45 = vld [vmem:[#allocation2 + $0x48] sm:$0xff]  ;;  %v577_v25 = vld [vmem:[#allocation2 + $0x1c0] sm:$0xff]  ;;  %v528_v52 = vld [vmem:[#allocation2 + $0x38] sm:$0xff] }
  0xed   :  { %635 = vmatpush.msrb.mxu2 %v564_v28  ;;  %624 = vmatpush.msra.mxu1 %v539_v37  ;;  %v576_v54 = vld [vmem:[#allocation2 + $0x1b8] sm:$0xff]  ;;  %v555_v28 = vld [vmem:[#allocation2 + $0x110] sm:$0xff]  ;;  %v554_v58 = vld [vmem:[#allocation2 + $0x108] sm:$0xff] }
  0xee   :  { %456 = vmatpush.msra.mxu0 %v409_v46  ;;  %516 = vmatpush.msrb.mxu3 %v412_v57  ;;  %v527_v37 = vld [vmem:[#allocation2 + $0x30] sm:$0xff]  ;;  %v526_v42 = vld [vmem:[#allocation2 + $0x28] sm:$0xff]  ;;  %v525_v46 = vld [vmem:[#allocation2 + $0x20] sm:$0xff] }
  0xef   :  { %1448 = vmatmul.msk.f32.vlgmr.msra.gmra.mxu0 %vm425_vm9, %v1935_v14  ;;  %1454 = vmatmul.msk.f32.vlgmr.msrb.gmra.mxu3 %vm425_vm9, %v1935_v14  ;;  %v580_v14 = vld [vmem:[#allocation2 + $0x1d8] sm:$0xff]  ;;  %v575_v40 = vld [vmem:[#allocation2 + $0x1b0] sm:$0xff]  ;;  %v574_v39 = vld [vmem:[#allocation2 + $0x1a8] sm:$0xff] }
  0xf0   :  { %591 = vmatpush.msrb.mxu0 %v536_v47  ;;  %651 = vmatpush.msra.mxu3 %v584_v55  ;;  %v524_v57 = vld [vmem:[#allocation2 + $0x18] sm:$0xff]  ;;  %v523_v47 = vld [vmem:[#allocation2 + $0x10] sm:$0xff]  ;;  %v522_v55 = vld [vmem:[#allocation2 + $0x8] sm:$0xff] }
  0xf1   :  { %636 = vmatpush.msrb.mxu2 %v563_v22  ;;  %625 = vmatpush.msra.mxu1 %v538_v1  ;;  %v537_v22 = vld [vmem:[#allocation2 + $0x80] sm:$0xff] }
  0xf2   :  { %592 = vmatpush.msrb.mxu0 %v535_v21  ;;  %652 = vmatpush.msra.mxu3 %v583_v48  ;;  %v553_v1 = vld [vmem:[#allocation2 + $0x100] sm:$0xff] }
  0xf3   :  { %637 = vmatpush.msrb.mxu2 %v562_v38  ;;  %626 = vmatpush.msra.mxu1 %v537_v22  ;;  %v573_v21 = vld [vmem:[#allocation2 + $0x1a0] sm:$0xff]  ;;  %v572_v38 = vld [vmem:[#allocation2 + $0x198] sm:$0xff]  ;;  %v807_v22 = vld [vmem:[#allocation4 + $0x1c8] sm:$0xff] }
  0xf4   :  { %593 = vmatpush.msrb.mxu0 %v534_v12  ;;  %653 = vmatpush.msra.mxu3 %v582_v51  ;;  %v521_v48 = vld [vmem:[#allocation2] sm:$0xff]  ;;  %v571_v12 = vld [vmem:[#allocation2 + $0x190] sm:$0xff]  ;;  %v570_v51 = vld [vmem:[#allocation2 + $0x188] sm:$0xff] }
  0xf5   :  { %638 = vmatpush.msrb.mxu2 %v561_v50  ;;  %v569_v50 = vld [vmem:[#allocation2 + $0x180] sm:$0xff] }
  0xf6   :  { %594 = vmatpush.msrb.mxu0 %v533_v11  ;;  %654 = vmatpush.msra.mxu3 %v581_v62  ;;  %v585_v11 = vld [vmem:[%s2661_s4] sm:$0xff]  ;;  %v1563_v62 = vmov 0   ;;  %s1564_s4 = smov 121  }
  0xf7   :  { %639 = vmatpush.msrb.mxu2 %v560_v15  ;;  %1485 = vset.pattern.permute.xlu2 %v1563_v62 }
  0xf8   :  { %595 = vmatpush.msrb.mxu0 %v532_v59  ;;  %655 = vmatpush.msra.mxu3 %v580_v14 }
  0xf9   :  { %640 = vmatpush.msrb.mxu2 %v559_v44  ;;  %1486 = vset.pattern.permute.xlu0 %v1563_v62 }
  0xfa   :  { %596 = vmatpush.msrb.mxu0 %v531_v18  ;;  %656 = vmatpush.msra.mxu3 %v579_v43 }
  0xfb   :  { %641 = vmatpush.msrb.mxu2 %v558_v30  ;;  %588 = vperm.xlu2 %1485, %v585_v11   ;;  %v798_v11 = vld [vmem:[#allocation4 + $0x180] sm:$0xff] }
  0xfc   :  { %597 = vmatpush.msrb.mxu0 %v530_v45  ;;  %657 = vmatpush.msra.mxu3 %v578_v35 }
  0xfd   :  { %642 = vmatpush.msrb.mxu2 %v557_v13  ;;  %1487 = vset.pattern.permute.xlu1 %v1563_v62 }
  0xfe   :  { %598 = vmatpush.msrb.mxu0 %v529_v20  ;;  %658 = vmatpush.msra.mxu3 %v577_v25 }
  0xff   :  { %643 = vmatpush.msrb.mxu2 %v556_v49 }
 0x100   :  { %599 = vmatpush.msrb.mxu0 %v528_v52  ;;  %659 = vmatpush.msra.mxu3 %v576_v54  ;;  %v706_v54 = vld [vmem:[%s2664_s7] sm:$0xff] }
 0x101   :  { %644 = vmatpush.msrb.mxu2 %v555_v28  ;;  %v2081_v28 = vld [vmem:[%s2659_s2] sm:$0xff] }
 0x102   :  { %600 = vmatpush.msrb.mxu0 %v527_v37  ;;  %660 = vmatpush.msra.mxu3 %v575_v40  ;;  %v1492_v37 = vld [vmem:[%s2659_s2 + $0x8] ss:$0 sm:$0xff] }
 0x103   :  { %645 = vmatpush.msrb.mxu2 %v554_v58  ;;  %v707_v40 = vld [vmem:[%s2664_s7 + $0x8] sm:$0xff] }
 0x104   :  { %601 = vmatpush.msrb.mxu0 %v526_v42  ;;  %661 = vmatpush.msra.mxu3 %v574_v39  ;;  %v810_v58 = vld [vmem:[#allocation4 + $0x1e0] sm:$0xff]  ;;  %v811_v42 = vld [vmem:[#allocation4 + $0x1e8] sm:$0xff]  ;;  %v700_v39 = vperm.slane %v2081_v28, 7 }
 0x105   :  { %646 = vmatpush.msrb.mxu2 %v553_v1  ;;  %814 = vmatpush.msrb.mxu1 %v810_v58  ;;  %v808_v1 = vld [vmem:[#allocation4 + $0x1d0] sm:$0xff] }
 0x106   :  { %602 = vmatpush.msrb.mxu0 %v525_v46  ;;  %662 = vmatpush.msra.mxu3 %v573_v21  ;;  %v696_v21 = vperm.slane %v2081_v28, 6  ;;  %v788_v58 = vld [vmem:[#allocation4 + $0x130] sm:$0xff] }
 0x107   :  { %837 = vmatpush.msra.mxu2 %v811_v42  ;;  %v782_v42 = vld [vmem:[#allocation4 + $0x100] sm:$0xff] }
 0x108   :  { %603 = vmatpush.msrb.mxu0 %v524_v57  ;;  %663 = vmatpush.msra.mxu3 %v572_v38  ;;  %v812_v57 = vld [vmem:[#allocation4 + $0x1f0] sm:$0xff]  ;;  %v802_v38 = vld [vmem:[#allocation4 + $0x1a0] sm:$0xff] }
 0x109   :  { %838 = vmatpush.msra.mxu2 %v807_v22 }
 0x10a   :  { %604 = vmatpush.msrb.mxu0 %v523_v47  ;;  %664 = vmatpush.msra.mxu3 %v571_v12  ;;  %v806_v47 = vld [vmem:[#allocation4 + $0x1c0] sm:$0xff]  ;;  %v803_v12 = vld [vmem:[#allocation4 + $0x1a8] sm:$0xff] }
 0x10b   :  { %815 = vmatpush.msrb.mxu1 %v806_v47  ;;  %839 = vmatpush.msra.mxu2 %v803_v12 }
 0x10c   :  { %605 = vmatpush.msrb.mxu0 %v522_v55  ;;  %665 = vmatpush.msra.mxu3 %v570_v51  ;;  %v804_v51 = vld [vmem:[#allocation4 + $0x1b0] sm:$0xff] }
 0x10d   :  { %816 = vmatpush.msrb.mxu1 %v802_v38  ;;  %v774_v38 = vld [vmem:[#allocation4 + $0xc0] sm:$0xff] }
 0x10e   :  { %606 = vmatpush.msrb.mxu0 %v521_v48  ;;  %666 = vmatpush.msra.mxu3 %v569_v50 }
 0x10f   :  { %817 = vmatpush.msrb.mxu1 %v798_v11  ;;  %v776_v11 = vld [vmem:[#allocation4 + $0xd0] sm:$0xff] }
 0x110   :  { %860 = vmatpush.msrb.mxu3 %v812_v57  ;;  %v784_v57 = vld [vmem:[#allocation4 + $0x110] sm:$0xff] }
 0x112   :  { %861 = vmatpush.msrb.mxu3 %v808_v1  ;;  %v680_v1 = vperm.slane %v2081_v28, 1 }
 0x114   :  { %862 = vmatpush.msrb.mxu3 %v804_v51  ;;  %v676_v51 = vperm.slane %v2081_v28, 0 }
 0x155   :  { %v589_v18 = vpop.permute.xlu2 %588 }
 0x160   :  { %v478_v15 = vpop.f32.mrf.mxu3 }
 0x161   :  { %627 = vmatmul.f32.vlgmr.msra.gmra.mxu1 %v478_v15  ;;  %v799_v15 = vld [vmem:[#allocation4 + $0x188] sm:$0xff] }
 0x162   :  { %840 = vmatpush.msra.mxu2 %v799_v15 }
 0x167   :  { %v498_v59 = vpop.f32.mrf.mxu2 }
 0x168   :  { %647 = vmatmul.f32.vlgmr.msrb.gmra.mxu2 %v498_v59  ;;  %v800_v59 = vld [vmem:[#allocation4 + $0x190] sm:$0xff] }
 0x169   :  { %863 = vmatpush.msrb.mxu3 %v800_v59 }
 0x16c   :  { %v458_v14 = vpop.f32.mrf.mxu0 }
 0x16d   :  { %607 = vmatmul.f32.vlgmr.msrb.gmra.mxu0 %v458_v14  ;;  %v794_v14 = vld [vmem:[#allocation4 + $0x160] sm:$0xff] }
 0x16e   :  { %818 = vmatpush.msrb.mxu1 %v794_v14  ;;  %v771_v14 = vld [vmem:[#allocation4 + $0xa8] sm:$0xff] }
 0x172   :  { %v518_v44 = vpop.f32.mrf.mxu3 }
 0x173   :  { %667 = vmatmul.f32.vlgmr.msra.gmra.mxu3 %v518_v44 }
 0x1de   :  { %v628_v45 = vpop.f32.mrf.mxu1 }
 0x1ea   :  { %v608_v43 = vpop.f32.mrf.mxu0 }
 0x1eb   :  { %v609_v30 = vadd.f32 %v608_v43, %v589_v18  ;;  %v648_v13 = vpop.f32.mrf.mxu2  ;;  %v692_v18 = vperm.slane %v2081_v28, 5  ;;  %v795_v43 = vld [vmem:[#allocation4 + $0x168] sm:$0xff] }
 0x1ec   :  { %841 = vmatpush.msra.mxu2 %v795_v43 }
 0x1ed   :  { %v629_v35 = vadd.f32 %v628_v45, %v609_v30  ;;  %v796_v30 = vld [vmem:[#allocation4 + $0x170] sm:$0xff]  ;;  %v790_v45 = vld [vmem:[#allocation4 + $0x140] sm:$0xff] }
 0x1ee   :  { %864 = vmatpush.msrb.mxu3 %v796_v30  ;;  %819 = vmatpush.msrb.mxu1 %v790_v45  ;;  %v767_v30 = vld [vmem:[#allocation4 + $0x88] sm:$0xff]  ;;  %v813_v45 = vld [vmem:[#allocation4 + $0x1f8] sm:$0xff] }
 0x1ef   :  { %v649_v20 = vadd.f32 %v648_v13, %v629_v35  ;;  %v791_v13 = vld [vmem:[#allocation4 + $0x148] sm:$0xff] }
 0x1f0   :  { %842 = vmatpush.msra.mxu2 %v791_v13  ;;  %v762_v13 = vld [vmem:[#allocation4 + $0x60] sm:$0xff] }
 0x1f6   :  { %v668_v25 = vpop.f32.mrf.mxu3 }
 0x1f7   :  { %v669_v49 = vadd.f32 %v668_v25, %v649_v20  ;;  %v792_v20 = vld [vmem:[#allocation4 + $0x150] sm:$0xff] }
 0x1f8   :  { %865 = vmatpush.msrb.mxu3 %v792_v20  ;;  %v763_v20 = vld [vmem:[#allocation4 + $0x68] sm:$0xff] }
 0x1f9   :  { %v2062_v52 = vmax.f32 %v669_v49, 0.0  ;;  %v786_v49 = vld [vmem:[#allocation4 + $0x120] sm:$0xff] }
 0x1fa   :  { %820 = vmatpush.msrb.mxu1 %v786_v49  ;;  %866 = vmatpush.msrb.mxu3 %v788_v58  ;;  %v764_v49 = vld [vmem:[#allocation4 + $0x70] sm:$0xff]  ;;  %v797_v58 = vld [vmem:[#allocation4 + $0x178] sm:$0xff] }
 0x1fb   :  { %694 = vrot.lane.b32.xlu2 %v2062_v52, %s1564_s4  ;;  %698 = vrot.lane.b32.xlu1 %v2062_v52, %s1565_s22 }
 0x1fc   :  { %702 = vrot.lane.b32.xlu0 %v2062_v52, %s1566_s8  ;;  %821 = vmatpush.msrb.mxu1 %v782_v42  ;;  %v793_v42 = vld [vmem:[#allocation4 + $0x158] sm:$0xff] }
 0x1fd   :  { %867 = vmatpush.msrb.mxu3 %v784_v57  ;;  %v781_v57 = vld [vmem:[#allocation4 + $0xf8] sm:$0xff] }
 0x203   :  { %682 = vrot.lane.b32.xlu2 %v2062_v52, %s1567_s23  ;;  %686 = vrot.lane.b32.xlu1 %v2062_v52, %s1558_s26 }
 0x204   :  { %690 = vrot.lane.b32.xlu0 %v2062_v52, %s1559_s27 }
 0x20b   :  { %710 = vperm.xlu2 %1485, %v706_v54   ;;  %674 = vrot.lane.b32.xlu1 %v2062_v52, %s1568_s16  ;;  %v688_v54 = vperm.slane %v2081_v28, 3 }
 0x20c   :  { %678 = vrot.lane.b32.xlu0 %v2062_v52, %s1551_s17 }
 0x214   :  { %715 = vperm.xlu0 %1486, %v707_v40   ;;  %v787_v40 = vld [vmem:[#allocation4 + $0x128] sm:$0xff] }
 0x215   :  { %843 = vmatpush.msra.mxu2 %v787_v40  ;;  %v673_v40 = vld [vmem:[%s2663_s6 + $0x8] sm:$0xff] }
 0x255   :  { %v695_v50 = vpop.permute.xlu2 %694 }
 0x256   :  { %v697_v44 = vmul.f32 %v696_v21, %v695_v50  ;;  %v779_v21 = vld [vmem:[#allocation4 + $0xe8] sm:$0xff] }
 0x257   :  { %v775_v50 = vld [vmem:[#allocation4 + $0xc8] sm:$0xff] }
 0x25d   :  { %v683_v47 = vpop.permute.xlu2 %682 }
 0x26d   :  { %v699_v46 = vpop.permute.xlu1 %698 }
 0x26e   :  { %v703_v55 = vpop.permute.xlu0 %702  ;;  %v701_v62 = vmul.f32 %v700_v39, %v699_v46  ;;  %v684_v39 = vperm.slane %v2081_v28, 2  ;;  %v783_v46 = vld [vmem:[#allocation4 + $0x108] sm:$0xff]  ;;  %v672_v28 = vld [vmem:[%s2663_s6] sm:$0xff] }
 0x26f   :  { %v705_v48 = vmul.f32 %v1492_v37, %v703_v55  ;;  %v778_v55 = vld [vmem:[#allocation4 + $0xe0] sm:$0xff]  ;;  %844 = vmatpush.msra.mxu2 %v783_v46  ;;  %v785_v46 = vld [vmem:[#allocation4 + $0x118] sm:$0xff] }
 0x270   :  { %v685_v12 = vmul.f32 %v684_v39, %v683_v47  ;;  %822 = vmatpush.msrb.mxu1 %v778_v55  ;;  %v789_v39 = vld [vmem:[#allocation4 + $0x138] sm:$0xff] }
 0x271   :  { %732 = vmatpush.msra.mxu0 %v705_v48  ;;  %v780_v48 = vld [vmem:[#allocation4 + $0xf0] sm:$0xff]  ;;  %845 = vmatpush.msra.mxu2 %v779_v21  ;;  %v777_v47 = vld [vmem:[#allocation4 + $0xd8] sm:$0xff]  ;;  %v758_v21 = vld [vmem:[#allocation4 + $0x40] sm:$0xff] }
 0x272   :  { %868 = vmatpush.msrb.mxu3 %v780_v48  ;;  %823 = vmatpush.msrb.mxu1 %v774_v38  ;;  %v773_v55 = vld [vmem:[#allocation4 + $0xb8] sm:$0xff]  ;;  %v759_v48 = vld [vmem:[#allocation4 + $0x48] sm:$0xff]  ;;  %v760_v38 = vld [vmem:[#allocation4 + $0x50] sm:$0xff] }
 0x273   :  { %733 = vmatpush.msra.mxu0 %v701_v62  ;;  %846 = vmatpush.msra.mxu2 %v775_v50  ;;  %v755_v50 = vld [vmem:[#allocation4 + $0x28] sm:$0xff] }
 0x274   :  { %869 = vmatpush.msrb.mxu3 %v776_v11  ;;  %v756_v11 = vld [vmem:[#allocation4 + $0x30] sm:$0xff] }
 0x275   :  { %734 = vmatpush.msra.mxu0 %v697_v44  ;;  %v687_v35 = vpop.permute.xlu1 %686  ;;  %v772_v44 = vld [vmem:[#allocation4 + $0xb0] sm:$0xff]  ;;  %847 = vmatpush.msra.mxu2 %v771_v14  ;;  %v753_v14 = vld [vmem:[#allocation4 + $0x18] sm:$0xff] }
 0x276   :  { %v691_v25 = vpop.permute.xlu0 %690  ;;  %v689_v22 = vmul.f32 %v688_v54, %v687_v35  ;;  %870 = vmatpush.msrb.mxu3 %v772_v44  ;;  %v768_v35 = vld [vmem:[#allocation4 + $0x90] sm:$0xff]  ;;  %v805_v54 = vld [vmem:[#allocation4 + $0x1b8] sm:$0xff]  ;;  %v711_v44 = vpop.permute.xlu2 %710 }
 0x277   :  { %v693_v37 = vmul.f32 %v692_v18, %v691_v25  ;;  %v766_v18 = vld [vmem:[#allocation4 + $0x80] sm:$0xff]  ;;  %v809_v25 = vld [vmem:[#allocation4 + $0x1d8] sm:$0xff]  ;;  %848 = vmatpush.msra.mxu2 %v767_v30 }
 0x278   :  { %871 = vmatpush.msrb.mxu3 %v768_v35 }
 0x279   :  { %735 = vmatpush.msra.mxu0 %v693_v37  ;;  %849 = vmatpush.msra.mxu2 %v763_v20  ;;  %v801_v37 = vld [vmem:[#allocation4 + $0x198] sm:$0xff] }
 0x27a   :  { %872 = vmatpush.msrb.mxu3 %v764_v49 }
 0x27b   :  { %736 = vmatpush.msra.mxu0 %v2062_v52  ;;  %v770_v52 = vld [vmem:[#allocation4 + $0xa0] sm:$0xff]  ;;  %850 = vmatpush.msra.mxu2 %v759_v48 }
 0x27c   :  { %824 = vmatpush.msrb.mxu1 %v770_v52  ;;  %873 = vmatpush.msrb.mxu3 %v760_v38  ;;  %v751_v52 = vld [vmem:[#allocation4 + $0x8] sm:$0xff] }
 0x27d   :  { %737 = vmatpush.msra.mxu0 %v689_v22  ;;  %v675_v62 = vpop.permute.xlu1 %674  ;;  %v769_v22 = vld [vmem:[#allocation4 + $0x98] sm:$0xff]  ;;  %851 = vmatpush.msra.mxu2 %v755_v50 }
 0x27e   :  { %v679_v15 = vpop.permute.xlu0 %678  ;;  %v677_v43 = vmul.f32 %v676_v51, %v675_v62  ;;  %825 = vmatpush.msrb.mxu1 %v766_v18  ;;  %v754_v51 = vld [vmem:[#allocation4 + $0x20] sm:$0xff]  ;;  %v757_v62 = vld [vmem:[#allocation4 + $0x38] sm:$0xff]  ;;  %874 = vmatpush.msrb.mxu3 %v756_v11 }
 0x27f   :  { %v681_v59 = vmul.f32 %v680_v1, %v679_v15  ;;  %738 = vmatpush.msra.mxu0 %v685_v12  ;;  %v765_v1 = vld [vmem:[#allocation4 + $0x78] sm:$0xff]  ;;  %v750_v15 = vld [vmem:[#allocation4] sm:$0xff]  ;;  %852 = vmatpush.msra.mxu2 %v751_v52 }
 0x280   :  { %826 = vmatpush.msrb.mxu1 %v762_v13  ;;  %v761_v12 = vld [vmem:[#allocation4 + $0x58] sm:$0xff] }
 0x281   :  { %739 = vmatpush.msra.mxu0 %v681_v59  ;;  %v752_v59 = vld [vmem:[#allocation4 + $0x10] sm:$0xff] }
 0x282   :  { %827 = vmatpush.msrb.mxu1 %v758_v21  ;;  %875 = vmatpush.msrb.mxu3 %v752_v59 }
 0x283   :  { %740 = vmatpush.msra.mxu0 %v677_v43 }
 0x284   :  { %1455 = vmatmul.msk.f32.vlgmr.msra.gmra.mxu0 %vm718_vm10, %v672_v28  ;;  %828 = vmatpush.msrb.mxu1 %v754_v51 }
 0x285   :  { %883 = vmatpush.msrb.mxu0 %v813_v45 }
 0x286   :  { %829 = vmatpush.msrb.mxu1 %v750_v15  ;;  %v716_v30 = vpop.permute.xlu0 %715 }
 0x287   :  { %884 = vmatpush.msrb.mxu0 %v809_v25 }
 0x289   :  { %885 = vmatpush.msrb.mxu0 %v805_v54 }
 0x28b   :  { %886 = vmatpush.msrb.mxu0 %v801_v37 }
 0x28c   :  { %1456 = vmatmul.msk.f32.gmra.mxu0 %vm718_vm10, %v673_v40 }
 0x28d   :  { %887 = vmatpush.msrb.mxu0 %v797_v58 }
 0x28f   :  { %888 = vmatpush.msrb.mxu0 %v793_v42 }
 0x291   :  { %889 = vmatpush.msrb.mxu0 %v789_v39 }
 0x293   :  { %890 = vmatpush.msrb.mxu0 %v785_v46 }
 0x295   :  { %891 = vmatpush.msrb.mxu0 %v781_v57 }
 0x297   :  { %892 = vmatpush.msrb.mxu0 %v777_v47 }
 0x299   :  { %893 = vmatpush.msrb.mxu0 %v773_v55 }
 0x29b   :  { %894 = vmatpush.msrb.mxu0 %v769_v22 }
 0x29d   :  { %895 = vmatpush.msrb.mxu0 %v765_v1 }
 0x29f   :  { %896 = vmatpush.msrb.mxu0 %v761_v12 }
 0x2a1   :  { %897 = vmatpush.msrb.mxu0 %v757_v62 }
 0x2a3   :  { %898 = vmatpush.msrb.mxu0 %v753_v14 }
 0x301   :  { %v742_v18 = vpop.f32.mrf.mxu0 }
 0x302   :  { %v743_v43 = vadd.f32 %v742_v18, %v711_v44 }
 0x304   :  { %v748_v28 = vmax.f32 %v743_v43, 0.0 }
 0x306   :  { %830 = vmatmul.f32.vlgmr.msrb.gmra.mxu1 %v748_v28  ;;  %853 = vmatmul.f32.vlgmr.msra.gmra.mxu2 %v748_v28 }
 0x307   :  { %876 = vmatmul.f32.vlgmr.msrb.gmra.mxu3 %v748_v28  ;;  %899 = vmatmul.f32.vlgmr.msrb.gmra.mxu0 %v748_v28 }
 0x309   :  { %v745_v45 = vpop.f32.mrf.mxu0 }
 0x30a   :  { %v746_v35 = vadd.f32 %v745_v45, %v716_v30 }
 0x30c   :  { %v749_v13 = vmax.f32 %v746_v35, 0.0 }
 0x30e   :  { %833 = vmatmul.f32.gmra.mxu1 %v749_v13  ;;  %856 = vmatmul.f32.gmra.mxu2 %v749_v13 }
 0x30f   :  { %879 = vmatmul.f32.gmra.mxu3 %v749_v13  ;;  %902 = vmatmul.f32.gmra.mxu0 %v749_v13 }
 0x383   :  { %v2105_v20 = vpop.f32.mrf.mxu1 }
 0x384   :  { %1036 = vrot.lane.b32.xlu0 %v2105_v20, %s1559_s27  ;;  %1068 = vrot.lane.b32.xlu2 %v2105_v20, %s1560_s28  ;;  %v2113_v25 = vpop.f32.mrf.mxu0 }
 0x385   :  { %1100 = vrot.lane.b32.xlu1 %v2105_v20, %s1561_s29  ;;  %2733 = vst [vmem:[#allocation25_spill] sm:$0xff] %v2113_v25 }
 0x389   :  { %v2141_v54 = vpop.f32.mrf.mxu2 }
 0x38a   :  { %v2127_v49 = vpop.f32.mrf.mxu3 }
 0x38b   :  { %2734 = vst [vmem:[#allocation26_spill] sm:$0xff] %v2127_v49  ;;  %v2155_v37 = vpop.f32.mrf.mxu1 }
 0x38c   :  { %1080 = vrot.lane.b32.xlu0 %v2113_v25, %s1560_s28  ;;  %1132 = vrot.lane.b32.xlu2 %v2105_v20, %s1562_s30  ;;  %v2169_v40 = vpop.f32.mrf.mxu0 }
 0x38d   :  { %1112 = vrot.lane.b32.xlu1 %v2113_v25, %s1561_s29  ;;  %2735 = vst [vmem:[#allocation27_spill] sm:$0xff] %v2169_v40 }
 0x391   :  { %v2199_v46 = vpop.f32.mrf.mxu2 }
 0x392   :  { %v2189_v42 = vpop.f32.mrf.mxu3 }
 0x394   :  { %1048 = vrot.lane.b32.xlu0 %v2113_v25, %s1559_s27  ;;  %1016 = vrot.lane.b32.xlu2 %v2113_v25, %s1558_s26 }
 0x395   :  { %1004 = vrot.lane.b32.xlu1 %v2105_v20, %s1558_s26 }
 0x39c   :  { %1076 = vrot.lane.b32.xlu0 %v2127_v49, %s1560_s28  ;;  %940 = vrot.lane.b32.xlu2 %v2105_v20, %s1556_s0 }
 0x39d   :  { %972 = vrot.lane.b32.xlu1 %v2105_v20, %s1557_s25 }
 0x3a4   :  { %1044 = vrot.lane.b32.xlu0 %v2127_v49, %s1559_s27  ;;  %908 = vrot.lane.b32.xlu2 %v2105_v20, %s1555_s24 }
 0x3a5   :  { %984 = vrot.lane.b32.xlu1 %v2113_v25, %s1557_s25 }
 0x3ac   :  { %1136 = vrot.lane.b32.xlu0 %v2141_v54, %s1562_s30  ;;  %1108 = vrot.lane.b32.xlu2 %v2127_v49, %s1561_s29 }
 0x3ad   :  { %1104 = vrot.lane.b32.xlu1 %v2141_v54, %s1561_s29 }
 0x3b4   :  { %944 = vrot.lane.b32.xlu0 %v2141_v54, %s1556_s0  ;;  %1072 = vrot.lane.b32.xlu2 %v2141_v54, %s1560_s28 }
 0x3b5   :  { %1140 = vrot.lane.b32.xlu1 %v2127_v49, %s1562_s30 }
 0x3bc   :  { %912 = vrot.lane.b32.xlu0 %v2141_v54, %s1555_s24  ;;  %1040 = vrot.lane.b32.xlu2 %v2141_v54, %s1559_s27 }
 0x3bd   :  { %1102 = vrot.lane.b32.xlu1 %v2155_v37, %s1561_s29 }
 0x3c4   :  { %1008 = vrot.lane.b32.xlu2 %v2141_v54, %s1558_s26  ;;  %1038 = vrot.lane.b32.xlu0 %v2155_v37, %s1559_s27 }
 0x3c5   :  { %1070 = vrot.lane.b32.xlu1 %v2155_v37, %s1560_s28 }
 0x3cc   :  { %976 = vrot.lane.b32.xlu2 %v2141_v54, %s1557_s25  ;;  %1082 = vrot.lane.b32.xlu0 %v2169_v40, %s1560_s28 }
 0x3cd   :  { %1114 = vrot.lane.b32.xlu1 %v2169_v40, %s1561_s29 }
 0x3d4   :  { %1134 = vrot.lane.b32.xlu2 %v2155_v37, %s1562_s30  ;;  %1018 = vrot.lane.b32.xlu0 %v2169_v40, %s1558_s26 }
 0x3d5   :  { %1006 = vrot.lane.b32.xlu1 %v2155_v37, %s1558_s26 }
 0x3dc   :  { %910 = vrot.lane.b32.xlu2 %v2155_v37, %s1555_s24  ;;  %942 = vrot.lane.b32.xlu0 %v2155_v37, %s1556_s0 }
 0x3dd   :  { %974 = vrot.lane.b32.xlu1 %v2155_v37, %s1557_s25 }
 0x3de   :  { %v1069_v58 = vpop.permute.xlu2 %1068 }
 0x3e4   :  { %1110 = vrot.lane.b32.xlu2 %v2189_v42, %s1561_s29  ;;  %1146 = vrot.lane.b32.xlu0 %v2169_v40, %s1562_s30 }
 0x3e5   :  { %1050 = vrot.lane.b32.xlu1 %v2169_v40, %s1559_s27 }
 0x3e6   :  { %v2197_v39 = vpop.permute.xlu2 %1132 }
 0x3ec   :  { %1012 = vrot.lane.b32.xlu2 %v2127_v49, %s1558_s26  ;;  %1074 = vrot.lane.b32.xlu0 %v2199_v46, %s1560_s28 }
 0x3ed   :  { %986 = vrot.lane.b32.xlu1 %v2169_v40, %s1557_s25 }
 0x3ee   :  { %v2207_v57 = vpop.permute.xlu2 %1016 }
 0x3f4   :  { %1042 = vrot.lane.b32.xlu2 %v2199_v46, %s1559_s27  ;;  %1046 = vrot.lane.b32.xlu0 %v2189_v42, %s1559_s27 }
 0x3f5   :  { %954 = vrot.lane.b32.xlu1 %v2169_v40, %s1556_s0 }
 0x3f6   :  { %v2215_v47 = vpop.permute.xlu2 %940  ;;  %v1037_v55 = vpop.permute.xlu0 %1036 }
 0x3f7   :  { %2736 = vst [vmem:[#allocation28_spill] sm:$0xff] %v2215_v47  ;;  %v1101_v22 = vpop.permute.xlu1 %1100 }
 0x3fc   :  { %1010 = vrot.lane.b32.xlu2 %v2199_v46, %s1558_s26  ;;  %1138 = vrot.lane.b32.xlu0 %v2199_v46, %s1562_s30 }
 0x3fd   :  { %1106 = vrot.lane.b32.xlu1 %v2199_v46, %s1561_s29 }
 0x3fe   :  { %v2223_v1 = vpop.permute.xlu2 %908  ;;  %v1081_v21 = vpop.permute.xlu0 %1080 }
 0x3ff   :  { %2737 = vst [vmem:[#allocation29_spill] sm:$0xff] %v2223_v1  ;;  %v1113_v48 = vpop.permute.xlu1 %1112  ;;  %v2227_v38 = vsel %vm272_vm7, %v1081_v21, %v1069_v58 }
 0x400   :  { %2738 = vst [vmem:[#allocation30_spill] sm:$0xff] %v2227_v38  ;;  %v2231_v12 = vsel %vm304_vm8, %v1113_v48, %v1101_v22 }
 0x401   :  { %2739 = vst [vmem:[#allocation31_spill] sm:$0xff] %v2231_v12 }
 0x404   :  { %978 = vrot.lane.b32.xlu2 %v2199_v46, %s1557_s25  ;;  %1144 = vrot.lane.b32.xlu0 %v2113_v25, %s1562_s30 }
 0x405   :  { %1078 = vrot.lane.b32.xlu1 %v2189_v42, %s1560_s28 }
 0x406   :  { %v1109_v51 = vpop.permute.xlu2 %1108  ;;  %v1049_v50 = vpop.permute.xlu0 %1048 }
 0x407   :  { %v2239_v11 = vpop.permute.xlu1 %1004  ;;  %v2243_v62 = vsel %vm240_vm3, %v1049_v50, %v1037_v55  ;;  %v1116_v63 = vsel %vm304_vm8, %v1109_v51, %v1113_v48 }
 0x408   :  { %2740 = vst [vmem:[#allocation32_spill] sm:$0xff] %v2243_v62  ;;  %v1126_v32 = vmul.f32 %v1116_v63, %v1843_v23 }
 0x40c   :  { %1142 = vrot.lane.b32.xlu2 %v2189_v42, %s1562_s30  ;;  %914 = vrot.lane.b32.xlu0 %v2199_v46, %s1555_s24 }
 0x40d   :  { %952 = vrot.lane.b32.xlu1 %v2113_v25, %s1556_s0 }
 0x40e   :  { %v1073_v15 = vpop.permute.xlu2 %1072  ;;  %v1077_v52 = vpop.permute.xlu0 %1076 }
 0x40f   :  { %v2253_v59 = vsel %vm272_vm7, %v1069_v58, %v1073_v15  ;;  %v2255_v14 = vpop.permute.xlu1 %972  ;;  %v2259_v44 = vsel %vm272_vm7, %v1077_v52, %v1081_v21  ;;  %v2263_v18 = vsel %vm272_vm7, %v1073_v15, %v1077_v52 }
 0x414   :  { %1014 = vrot.lane.b32.xlu2 %v2189_v42, %s1558_s26  ;;  %920 = vrot.lane.b32.xlu0 %v2113_v25, %s1555_s24 }
 0x415   :  { %946 = vrot.lane.b32.xlu1 %v2199_v46, %s1556_s0 }
 0x416   :  { %v1041_v43 = vpop.permute.xlu2 %1040  ;;  %v1045_v28 = vpop.permute.xlu0 %1044 }
 0x417   :  { %v2273_v30 = vsel %vm240_vm3, %v1037_v55, %v1041_v43  ;;  %v2275_v45 = vpop.permute.xlu1 %984  ;;  %v2279_v35 = vsel %vm240_vm3, %v1045_v28, %v1049_v50  ;;  %v2283_v13 = vsel %vm240_vm3, %v1041_v43, %v1045_v28  ;;  %v1164_v43 = vld [vmem:[%s2667_s10] sm:$0xff] }
 0x41c   :  { %982 = vrot.lane.b32.xlu2 %v2189_v42, %s1557_s25  ;;  %948 = vrot.lane.b32.xlu0 %v2127_v49, %s1556_s0 }
 0x41d   :  { %922 = vrot.lane.b32.xlu1 %v2169_v40, %s1555_s24 }
 0x41e   :  { %v2291_v58 = vpop.permute.xlu2 %1008  ;;  %v2293_v55 = vpop.permute.xlu0 %1136 }
 0x41f   :  { %v2299_v21 = vsel %vm208_vm4, %v2239_v11, %v2291_v58  ;;  %v1105_v50 = vpop.permute.xlu1 %1104 }
 0x420   :  { %2741 = vst [vmem:[#allocation33_spill] sm:$0xff] %v2299_v21  ;;  %v1118_v15 = vsel %vm304_vm8, %v1105_v50, %v1109_v51  ;;  %v1120_v52 = vsel %vm304_vm8, %v1101_v22, %v1105_v50 }
 0x424   :  { %950 = vrot.lane.b32.xlu2 %v2189_v42, %s1556_s0  ;;  %1167 = vperm.xlu0 %1486, %v1164_v43  }
 0x425   :  { %980 = vrot.lane.b32.xlu1 %v2127_v49, %s1557_s25 }
 0x426   :  { %v2312_v28 = vpop.permute.xlu2 %976  ;;  %v2314_v2 = vpop.permute.xlu0 %944 }
 0x427   :  { %2742 = vst [vmem:[#allocation34_spill] sm:$0xff] %v2312_v28  ;;  %v2316_v31 = vpop.permute.xlu1 %1140 }
 0x428   :  { %2743 = vst [vmem:[#allocation35_spill] sm:$0xff] %v2314_v2 }
 0x42c   :  { %916 = vrot.lane.b32.xlu2 %v2127_v49, %s1555_s24 }
 0x42d   :  { %918 = vrot.lane.b32.xlu1 %v2189_v42, %s1555_s24 }
 0x42e   :  { %v2322_v22 = vpop.permute.xlu2 %1134  ;;  %v2324_v50 = vpop.permute.xlu0 %912 }
 0x42f   :  { %2744 = vst [vmem:[#allocation36_spill] sm:$0xff] %v2324_v50  ;;  %v1103_v43 = vpop.permute.xlu1 %1102 }
 0x436   :  { %v2326_v4 = vpop.permute.xlu2 %910  ;;  %v1039_v25 = vpop.permute.xlu0 %1038 }
 0x437   :  { %2745 = vst [vmem:[#allocation37_spill] sm:$0xff] %v2326_v4  ;;  %v1071_v26 = vpop.permute.xlu1 %1070 }
 0x43e   :  { %v1111_v40 = vpop.permute.xlu2 %1110  ;;  %v2328_v19 = vpop.permute.xlu0 %1082 }
 0x43f   :  { %v1115_v62 = vpop.permute.xlu1 %1114  ;;  %v2333_v9 = vsel %vm272_vm7, %v2328_v19, %v1071_v26 }
 0x440   :  { %2746 = vst [vmem:[#allocation38_spill] sm:$0xff] %v2333_v9  ;;  %v1117_v38 = vsel %vm304_vm8, %v1111_v40, %v1115_v62  ;;  %v2341_v3 = vsel %vm304_vm8, %v1115_v62, %v1103_v43 }
 0x441   :  { %2747 = vst [vmem:[#allocation39_spill] sm:$0xff] %v2341_v3  ;;  %v1130_v12 = vmul.f32 %v1117_v38, %v1843_v23 }
 0x443   :  { %1254 = vmatpush.msra.mxu0 %v1130_v12 }
 0x445   :  { %1255 = vmatpush.msra.mxu0 %v1126_v32 }
 0x446   :  { %v2345_v60 = vpop.permute.xlu0 %1018  ;;  %v2349_v9 = vpop.permute.xlu2 %1012 }
 0x447   :  { %v2347_v61 = vpop.permute.xlu1 %1006 }
 0x44e   :  { %v2351_v48 = vpop.permute.xlu0 %942  ;;  %v1043_v1 = vpop.permute.xlu2 %1042 }
 0x44f   :  { %2748 = vst [vmem:[#allocation40_spill] sm:$0xff] %v2351_v48  ;;  %v2353_v51 = vpop.permute.xlu1 %974  ;;  %v1493_v48 = vld [vmem:[%s2658_s1 + $0x20] ss:$0 sm:$0xff] }
 0x456   :  { %v1147_v50 = vpop.permute.xlu0 %1146  ;;  %v2362_v23 = vpop.permute.xlu2 %1010 }
 0x457   :  { %v2355_v62 = vpop.permute.xlu1 %1050 }
 0x458   :  { %v2360_v63 = vsel %vm240_vm3, %v2355_v62, %v1039_v25 }
 0x459   :  { %2749 = vst [vmem:[#allocation41_spill] sm:$0xff] %v2360_v63  ;;  %v1152_v63 = vsel %vm336_vm0, %v2197_v39, %v2293_v55 }
 0x45a   :  { %v1156_v36 = vmul.f32 %v1493_v48, %v1152_v63  ;;  %v1094_v63 = vmul.f32 %v2259_v44, %v1897_v27 }
 0x45e   :  { %v1075_v32 = vpop.permute.xlu0 %1074  ;;  %v2366_v12 = vpop.permute.xlu2 %978 }
 0x45f   :  { %v2364_v38 = vpop.permute.xlu1 %986  ;;  %v1089_v49 = vsel %vm272_vm7, %v1071_v26, %v1075_v32  ;;  %v1494_v26 = vld [vmem:[%s2658_s1 + $0x28] ss:$0 sm:$0xff] }
 0x466   :  { %v1047_v3 = vpop.permute.xlu0 %1046  ;;  %v1143_v29 = vpop.permute.xlu2 %1142 }
 0x467   :  { %v2368_v4 = vpop.permute.xlu1 %954 }
 0x468   :  { %2750 = vst [vmem:[#allocation42_spill] sm:$0xff] %v2368_v4 }
 0x46e   :  { %v1139_v5 = vpop.permute.xlu0 %1138 }
 0x46f   :  { %v1107_v2 = vpop.permute.xlu1 %1106  ;;  %v1153_v7 = vsel %vm336_vm0, %v2322_v22, %v1139_v5  ;;  %v1151_v34 = vsel %vm336_vm0, %v1139_v5, %v1143_v29  ;;  %v1096_v5 = vmul.f32 %v1089_v49, %v1970_v53 }
 0x470   :  { %v1119_v47 = vsel %vm304_vm8, %v1107_v2, %v1111_v40  ;;  %v1121_v6 = vsel %vm304_vm8, %v1103_v43, %v1107_v2  ;;  %v1160_v21 = vmul.f32 %v1493_v48, %v1153_v7  ;;  %v1124_v40 = vmul.f32 %v1120_v52, %v1916_v41  ;;  %v2432_v48 = vpop.permute.xlu2 %1014 }
 0x471   :  { %v1128_v28 = vmul.f32 %v1121_v6, %v1916_v41  ;;  %v1129_v4 = vmul.f32 %v1119_v47, %v1808_v10  ;;  %v2394_v6 = vld [vmem:[%s2666_s9 + $0x8] sm:$0xff]  ;;  %v1125_v2 = vmul.f32 %v1118_v15, %v1808_v10  ;;  %v1150_v7 = vsel %vm336_vm0, %v2293_v55, %v2316_v31 }
 0x472   :  { %1208 = vmatpush.msrb.mxu2 %v1160_v21  ;;  %v1149_v41 = vsel %vm336_vm0, %v1143_v29, %v1147_v50  ;;  %v1161_v47 = vmul.f32 %v1494_v26, %v1151_v34  ;;  %v1157_v21 = vmul.f32 %v1494_v26, %v1150_v7  ;;  %v1092_v34 = vmul.f32 %v2253_v59, %v1970_v53 }
 0x473   :  { %1174 = vmatpush.msra.mxu1 %v1128_v28  ;;  %1214 = vmatpush.msra.mxu3 %v1129_v4  ;;  %v1057_v4 = vsel %vm240_vm3, %v1039_v25, %v1043_v1  ;;  %v1155_v59 = vsel %vm336_vm0, %v1147_v50, %v2322_v22  ;;  %v1055_v43 = vsel %vm240_vm3, %v1043_v1, %v1047_v3 }
 0x474   :  { %1209 = vmatpush.msrb.mxu2 %v1156_v36  ;;  %v1495_v36 = vld [vmem:[%s2658_s1 + $0x30] ss:$0 sm:$0xff]  ;;  %v1064_v53 = vmul.f32 %v1057_v4, %v1826_v16  ;;  %v1060_v22 = vmul.f32 %v2273_v30, %v1826_v16  ;;  %v1065_v44 = vmul.f32 %v1055_v43, %v1781_v0  ;;  %v1061_v16 = vmul.f32 %v2283_v13, %v1781_v0  ;;  %v2757_v4 = vld [vmem:[#allocation34_spill] sm:$0xff] }
 0x475   :  { %1175 = vmatpush.msra.mxu1 %v1124_v40  ;;  %1215 = vmatpush.msra.mxu3 %v1125_v2  ;;  %v1162_v55 = vmul.f32 %v1495_v36, %v1149_v41  ;;  %v1062_v50 = vmul.f32 %v2279_v35, %v1859_v33  ;;  %v1026_v0 = vsel %vm208_vm4, %v2207_v57, %v2239_v11  ;;  %v2752_v2 = vld [vmem:[#allocation14_spill] sm:$0xff]  ;;  %v2754_v41 = vld [vmem:[#allocation33_spill] sm:$0xff] }
 0x476   :  { %1457 = vmatmul.msk.f32.vlgmr.msrb.gmra.mxu2 %vm1170_vm11, %v2394_v6  ;;  %v1145_v10 = vpop.permute.xlu0 %1144  ;;  %v1028_v35 = vmul.f32 %v1026_v0, %v1893_v24  ;;  %v1029_v26 = vmul.f32 %v2754_v41, %v1803_v8  ;;  %v2763_v43 = vld [vmem:[#allocation10_spill] sm:$0xff]  ;;  %v2768_v0 = vld [vmem:[#allocation21_spill] sm:$0xff] }
 0x477   :  { %1248 = vmatpush.msra.mxu2 %v1161_v47  ;;  %v1079_v49 = vpop.permute.xlu1 %1078  ;;  %1176 = vmatpush.msra.mxu1 %v1096_v5  ;;  %v1148_v29 = vsel %vm336_vm0, %v2316_v31, %v1145_v10  ;;  %v1154_v1 = vsel %vm336_vm0, %v1145_v10, %v2197_v39  ;;  %v1027_v39 = vsel %vm208_vm4, %v2345_v60, %v2347_v61  ;;  %v2753_v5 = vld [vmem:[#allocation26_spill] sm:$0xff] }
 0x478   :  { %v1085_v15 = vsel %vm272_vm7, %v1079_v49, %v2328_v19  ;;  %v1087_v25 = vsel %vm272_vm7, %v1075_v32, %v1079_v49  ;;  %v1158_v31 = vmul.f32 %v1495_v36, %v1148_v29  ;;  %v1093_v19 = vmul.f32 %v2263_v18, %v1829_v17  ;;  %v2756_v47 = vld [vmem:[#allocation42_spill] sm:$0xff]  ;;  %v2758_v29 = vld [vmem:[#allocation11_spill] sm:$0xff]  ;;  %v2759_v36 = vld [vmem:[#allocation28_spill] sm:$0xff] }
 0x479   :  { %v1097_v52 = vmul.f32 %v1087_v25, %v1829_v17  ;;  %v1098_v28 = vmul.f32 %v1085_v15, %v1897_v27  ;;  %1249 = vmatpush.msra.mxu2 %v1157_v21  ;;  %1177 = vmatpush.msra.mxu1 %v1092_v34  ;;  %v1053_v32 = vsel %vm240_vm3, %v1047_v3, %v2355_v62  ;;  %v1496_v17 = vld [vmem:[%s2658_s1 + $0x38] ss:$0 sm:$0xff]  ;;  %v2761_v25 = vld [vmem:[#allocation12_spill] sm:$0xff] }
 0x47a   :  { %v1163_v27 = vmul.f32 %v1496_v17, %v1155_v59  ;;  %v1066_v3 = vmul.f32 %v1053_v32, %v1859_v33  ;;  %v1159_v18 = vmul.f32 %v1496_v17, %v1154_v1  ;;  %v1032_v13 = vmul.f32 %v1027_v39, %v1893_v24  ;;  %v2764_v32 = vld [vmem:[#allocation37_spill] sm:$0xff]  ;;  %v2773_v41 = vld [vmem:[#allocation38_spill] sm:$0xff] }
 0x47b   :  { %1288 = vmatpush.msrb.mxu2 %v1162_v55  ;;  %1216 = vmatpush.msra.mxu3 %v1097_v52  ;;  %v1025_v62 = vsel %vm208_vm4, %v2347_v61, %v2362_v23  ;;  %v995_v33 = vsel %vm176_vm5, %v2364_v38, %v2353_v51  ;;  %v2486_v61 = vpop.permute.xlu2 %982  ;;  %v993_v24 = vsel %vm176_vm5, %v2353_v51, %v2366_v12  ;;  %v2760_v55 = vld [vmem:[#allocation19_spill] sm:$0xff] }
 0x47c   :  { %1256 = vmatpush.msra.mxu0 %v1098_v28  ;;  %1178 = vmatpush.msra.mxu1 %v1064_v53  ;;  %v1033_v40 = vmul.f32 %v1025_v62, %v1803_v8  ;;  %v991_v51 = vsel %vm176_vm5, %v2366_v12, %v2486_v61  ;;  %v992_v8 = vsel %vm176_vm5, %v2255_v14, %v2757_v4 }
 0x47d   :  { %1289 = vmatpush.msrb.mxu2 %v1158_v31  ;;  %1217 = vmatpush.msra.mxu3 %v1093_v19  ;;  %v1001_v34 = vmul.f32 %v993_v24, %v2758_v29  ;;  %v1002_v52 = vmul.f32 %v991_v51, %v2761_v25  ;;  %v997_v28 = vmul.f32 %v992_v8, %v2758_v29  ;;  %v2762_v31 = vld [vmem:[#allocation35_spill] sm:$0xff]  ;;  %v2774_v51 = vld [vmem:[#allocation30_spill] sm:$0xff]  ;;  %v2775_v8 = vld [vmem:[#allocation9_spill] sm:$0xff] }
 0x47e   :  { %1257 = vmatpush.msra.mxu0 %v1094_v63  ;;  %1179 = vmatpush.msra.mxu1 %v1060_v22  ;;  %v2482_v11 = vpop.permute.xlu0 %914  ;;  %v960_v53 = vsel %vm144_vm2, %v2759_v36, %v2762_v31  ;;  %v2777_v29 = vld [vmem:[#allocation41_spill] sm:$0xff] }
 0x47f   :  { %1458 = vmatmul.msk.f32.vlgmr.msra.gmra.mxu2 %vm1170_vm11, %v2394_v6  ;;  %v2459_v30 = vpop.permute.xlu1 %952  ;;  %1218 = vmatpush.msra.mxu3 %v1065_v44  ;;  %v929_v22 = vsel %vm112_vm1, %v2764_v32, %v2482_v11  ;;  %v965_v1 = vmul.f32 %v960_v53, %v2763_v43  ;;  %v2766_v44 = vld [vmem:[#allocation29_spill] sm:$0xff] }
 0x480   :  { %1328 = vmatpush.msra.mxu2 %v1163_v27  ;;  %1180 = vmatpush.msra.mxu1 %v2155_v37  ;;  %v1023_v37 = vsel %vm208_vm4, %v2362_v23, %v2432_v48  ;;  %v1022_v23 = vsel %vm208_vm4, %v2291_v58, %v2349_v9  ;;  %v2755_v58 = vld [vmem:[#allocation40_spill] sm:$0xff]  ;;  %v962_v12 = vsel %vm144_vm2, %v2459_v30, %v2759_v36 }
 0x481   :  { %1258 = vmatpush.msra.mxu0 %v1066_v3  ;;  %1219 = vmatpush.msra.mxu3 %v1061_v16  ;;  %v1034_v7 = vmul.f32 %v1023_v37, %v2752_v2  ;;  %v1030_v49 = vmul.f32 %v1022_v23, %v2752_v2  ;;  %v964_v59 = vmul.f32 %v962_v12, %v2760_v55  ;;  %v2765_v27 = vld [vmem:[#allocation36_spill] sm:$0xff]  ;;  %v906_v37 = vld [vmem:[%s2666_s9] sm:$0xff] }
 0x482   :  { %1329 = vmatpush.msra.mxu2 %v1159_v18  ;;  %1181 = vmatpush.msra.mxu1 %v2105_v20  ;;  %v994_v20 = vsel %vm176_vm5, %v2275_v45, %v2255_v14  ;;  %v928_v3 = vsel %vm112_vm1, %v2766_v44, %v2765_v27  ;;  %v2767_v18 = vld [vmem:[#allocation8_spill] sm:$0xff] }
 0x483   :  { %1259 = vmatpush.msra.mxu0 %v1062_v50  ;;  %1220 = vmatpush.msra.mxu3 %v2199_v46  ;;  %v937_v50 = vmul.f32 %v929_v22, %v2767_v18  ;;  %v951_v62 = vpop.permute.xlu2 %950  ;;  %v2778_v12 = vld [vmem:[#allocation32_spill] sm:$0xff] }
 0x484   :  { %1182 = vmatpush.msra.mxu1 %v1032_v13 }
 0x485   :  { %1260 = vmatpush.msra.mxu0 %v2189_v42  ;;  %1221 = vmatpush.msra.mxu3 %v2141_v54  ;;  %v2751_v42 = vld [vmem:[#allocation23_spill] sm:$0xff]  ;;  %v963_v54 = vsel %vm144_vm2, %v2756_v47, %v2755_v58 }
 0x486   :  { %v1000_v46 = vmul.f32 %v995_v33, %v2751_v42  ;;  %1183 = vmatpush.msra.mxu1 %v1028_v35  ;;  %v996_v21 = vmul.f32 %v994_v20, %v2751_v42  ;;  %v968_v15 = vmul.f32 %v963_v54, %v2760_v55  ;;  %v2541_v63 = vpop.permute.xlu0 %920  ;;  %v2769_v35 = vld [vmem:[#allocation15_spill] sm:$0xff] }
 0x487   :  { %1261 = vmatpush.msra.mxu0 %v2753_v5  ;;  %v947_v10 = vpop.permute.xlu1 %946  ;;  %1222 = vmatpush.msra.mxu3 %v1033_v40  ;;  %v930_v16 = vsel %vm112_vm1, %v2541_v63, %v2766_v44  ;;  %v2770_v20 = vld [vmem:[#allocation39_spill] sm:$0xff]  ;;  %v2772_v5 = vld [vmem:[#allocation18_spill] sm:$0xff] }
 0x488   :  { %1459 = vmatmul.msk.f32.vlgmr.msrb.gmra.mxu2 %vm1170_vm11, %v2394_v6  ;;  %1184 = vmatpush.msra.mxu1 %v1000_v46  ;;  %v961_v14 = vsel %vm144_vm2, %v2755_v58, %v947_v10  ;;  %v932_v33 = vmul.f32 %v930_v16, %v2768_v0  ;;  %v1131_v23 = vmul.f32 %v2770_v20, %v2769_v35  ;;  %v2771_v40 = vld [vmem:[#allocation31_spill] sm:$0xff]  ;;  %v2785_v16 = vld [vmem:[#allocation22_spill] sm:$0xff] }
 0x489   :  { %1262 = vmatpush.msra.mxu0 %v1034_v7  ;;  %1223 = vmatpush.msra.mxu3 %v1029_v26  ;;  %v969_v19 = vmul.f32 %v961_v14, %v2763_v43  ;;  %v1127_v24 = vmul.f32 %v2771_v40, %v2769_v35  ;;  %v959_v2 = vsel %vm144_vm2, %v947_v10, %v951_v62  ;;  %v2776_v10 = vld [vmem:[#allocation16_spill] sm:$0xff]  ;;  %v2779_v14 = vld [vmem:[#allocation13_spill] sm:$0xff] }
 0x48a   :  { %1185 = vmatpush.msra.mxu1 %v996_v21  ;;  %v1099_v26 = vmul.f32 %v2773_v41, %v2772_v5  ;;  %v1095_v21 = vmul.f32 %v2774_v51, %v2772_v5  ;;  %v1063_v55 = vmul.f32 %v2778_v12, %v2776_v10  ;;  %v1020_v43 = vsel %vm208_vm4, %v2349_v9, %v2207_v57 }
 0x48b   :  { %1263 = vmatpush.msra.mxu0 %v1030_v49  ;;  %1224 = vmatpush.msra.mxu3 %v1001_v34  ;;  %v970_v49 = vmul.f32 %v959_v2, %v2775_v8  ;;  %v917_v34 = vpop.permute.xlu2 %916  ;;  %v957_v57 = vsel %vm144_vm2, %v951_v62, %v2756_v47  ;;  %v1338_v62 = vld [vmem:[%s2668_s11] sm:$0x7] }
 0x48c   :  { %1186 = vmatpush.msra.mxu1 %v968_v15  ;;  %v924_v47 = vsel %vm112_vm1, %v917_v34, %v2541_v63 }
 0x48d   :  { %1264 = vmatpush.msra.mxu0 %v1002_v52  ;;  %1225 = vmatpush.msra.mxu3 %v997_v28 }
 0x48e   :  { %1187 = vmatpush.msra.mxu1 %v964_v59  ;;  %v949_v42 = vpop.permute.xlu0 %948  ;;  %v2780_v59 = vld [vmem:[#allocation27_spill] sm:$0xff] }
 0x48f   :  { %v2548_v17 = vpop.permute.xlu1 %922  ;;  %1226 = vmatpush.msra.mxu3 %v969_v19  ;;  %v958_v54 = vsel %vm144_vm2, %v2762_v31, %v949_v42  ;;  %v1021_v31 = vsel %vm208_vm4, %v2432_v48, %v2345_v60  ;;  %v2781_v19 = vld [vmem:[#allocation17_spill] sm:$0xff]  ;;  %v989_v60 = vsel %vm176_vm5, %v2486_v61, %v2364_v38  ;;  %v956_v38 = vsel %vm144_vm2, %v949_v42, %v2459_v30  ;;  %v2784_v61 = vld [vmem:[#allocation20_spill] sm:$0xff] }
 0x490   :  { %1460 = vmatmul.msk.f32.vlgmr.msra.gmra.mxu2 %vm1170_vm11, %v2394_v6  ;;  %v931_v39 = vsel %vm112_vm1, %v2548_v17, %v2764_v32  ;;  %v933_v6 = vmul.f32 %v928_v3, %v2767_v18  ;;  %v966_v36 = vmul.f32 %v958_v54, %v2775_v8  ;;  %v2782_v32 = vld [vmem:[#allocation25_spill] sm:$0xff]  ;;  %v1031_v48 = vmul.f32 %v1020_v43, %v2781_v19 }
 0x491   :  { %v936_v13 = vmul.f32 %v931_v39, %v2768_v0  ;;  %1227 = vmatpush.msra.mxu3 %v965_v1  ;;  %v2783_v1 = vld [vmem:[#allocation24_spill] sm:$0xff]  ;;  %v971_v44 = vmul.f32 %v957_v57, %v2784_v61  ;;  %v967_v3 = vmul.f32 %v956_v38, %v2784_v61  ;;  %v935_v18 = vmul.f32 %v924_v47, %v2785_v16 }
 0x492   :  { %v1003_v9 = vmul.f32 %v989_v60, %v2783_v1 }
 0x493   :  { %1188 = vmatpush.msra.mxu1 %v936_v13  ;;  %1228 = vmatpush.msra.mxu3 %v937_v50 }
 0x495   :  { %1189 = vmatpush.msra.mxu1 %v932_v33  ;;  %1229 = vmatpush.msra.mxu3 %v933_v6 }
 0x496   :  { %1190 = vmatmul.f32.vlgmr.msra.gmra.mxu1 %v906_v37  ;;  %1230 = vmatmul.f32.vlgmr.msra.gmra.mxu3 %v906_v37  ;;  %v1168_v50 = vpop.permute.xlu0 %1167 }
 0x497   :  { %1294 = vmatpush.msrb.mxu1 %v1131_v23  ;;  %v981_v46 = vpop.permute.xlu1 %980 }
 0x498   :  { %v990_v7 = vsel %vm176_vm5, %v2757_v4, %v981_v46  ;;  %v1067_v4 = vmul.f32 %v2777_v29, %v2776_v10  ;;  %v988_v22 = vsel %vm176_vm5, %v981_v46, %v2275_v45 }
 0x499   :  { %v998_v58 = vmul.f32 %v990_v7, %v2761_v25  ;;  %1295 = vmatpush.msrb.mxu1 %v1127_v24  ;;  %v926_v25 = vsel %vm112_vm1, %v2765_v27, %v917_v34  ;;  %v999_v27 = vmul.f32 %v988_v22, %v2783_v1 }
 0x49a   :  { %v934_v53 = vmul.f32 %v926_v25, %v2779_v14 }
 0x49b   :  { %1296 = vmatpush.msrb.mxu1 %v1099_v26  ;;  %1265 = vmatpush.msra.mxu0 %v998_v58 }
 0x49d   :  { %1297 = vmatpush.msrb.mxu1 %v1095_v21  ;;  %1266 = vmatpush.msra.mxu0 %v970_v49 }
 0x49f   :  { %1298 = vmatpush.msrb.mxu1 %v1067_v4  ;;  %v919_v15 = vpop.permute.xlu1 %918  ;;  %1267 = vmatpush.msra.mxu0 %v966_v36 }
 0x4a0   :  { %v927_v52 = vsel %vm112_vm1, %v2482_v11, %v919_v15  ;;  %v1035_v11 = vmul.f32 %v1021_v31, %v2781_v19  ;;  %v925_v45 = vsel %vm112_vm1, %v919_v15, %v2548_v17 }
 0x4a1   :  { %v938_v28 = vmul.f32 %v927_v52, %v2779_v14  ;;  %1299 = vmatpush.msrb.mxu1 %v1063_v55  ;;  %v939_v39 = vmul.f32 %v925_v45, %v2785_v16 }
 0x4a3   :  { %1300 = vmatpush.msrb.mxu1 %v2780_v59  ;;  %1268 = vmatpush.msra.mxu0 %v938_v28 }
 0x4a5   :  { %1301 = vmatpush.msrb.mxu1 %v2782_v32  ;;  %1269 = vmatpush.msra.mxu0 %v934_v53 }
 0x4a6   :  { %1270 = vmatmul.f32.vlgmr.msra.gmra.mxu0 %v906_v37 }
 0x4a7   :  { %1302 = vmatpush.msrb.mxu1 %v1035_v11 }
 0x4a9   :  { %1303 = vmatpush.msrb.mxu1 %v1031_v48 }
 0x4ab   :  { %1304 = vmatpush.msrb.mxu1 %v1003_v9 }
 0x4ad   :  { %1305 = vmatpush.msrb.mxu1 %v999_v27 }
 0x4af   :  { %1306 = vmatpush.msrb.mxu1 %v971_v44 }
 0x4b1   :  { %1307 = vmatpush.msrb.mxu1 %v967_v3 }
 0x4b3   :  { %1308 = vmatpush.msrb.mxu1 %v939_v39 }
 0x4b5   :  { %1309 = vmatpush.msrb.mxu1 %v935_v18 }
 0x4b6   :  { %1310 = vmatmul.f32.vlgmr.msrb.gmra.mxu1 %v906_v37  ;;  %v1339_v37 = vld [vmem:[%s2669_s12] sm:$0x7] }
 0x4b7   :  { %1342 = vperm.xlu1 %1487, %v1339_v37  }
 0x4f9   :  { %v1211_v30 = vpop.f32.mrf.mxu2 }
 0x502   :  { %v1251_v63 = vpop.f32.mrf.mxu2 }
 0x50b   :  { %v1291_v40 = vpop.f32.mrf.mxu2 }
 0x513   :  { %v1191_v0 = vpop.f32.mrf.mxu1  ;;  %v1331_v7 = vpop.f32.mrf.mxu2 }
 0x514   :  { %v1192_v13 = vadd.f32 %v1191_v0, %v1168_v50 }
 0x516   :  { %v1212_v17 = vadd.f32 %v1211_v30, %v1192_v13 }
 0x518   :  { %v1334_v6 = vmax.f32 %v1212_v17, 0.0 }
 0x519   :  { %v1231_v56 = vpop.f32.mrf.mxu3 }
 0x51a   :  { %v1232_v33 = vadd.f32 %v1231_v56, %v1168_v50  ;;  %1364 = vmatpush.msrb.mxu3 %v1334_v6 }
 0x51b   :  { %1461 = vmatmul.msk.f32.vlgmr.msrb.gmra.mxu3 %vm1345_vm12, %v1338_v62 }
 0x51c   :  { %v1252_v35 = vadd.f32 %v1251_v63, %v1232_v33 }
 0x51e   :  { %v1335_v20 = vmax.f32 %v1252_v35, 0.0 }
 0x520   :  { %1384 = vmatpush.msrb.mxu2 %v1335_v20 }
 0x521   :  { %1462 = vmatmul.msk.f32.vlgmr.msrb.gmra.mxu2 %vm1345_vm12, %v1338_v62 }
 0x523   :  { %v1271_v23 = vpop.f32.mrf.mxu0 }
 0x524   :  { %v1272_v24 = vadd.f32 %v1271_v23, %v1168_v50 }
 0x526   :  { %v1292_v42 = vadd.f32 %v1291_v40, %v1272_v24 }
 0x528   :  { %v1336_v46 = vmax.f32 %v1292_v42, 0.0 }
 0x529   :  { %v1343_v58 = vpop.permute.xlu1 %1342 }
 0x52a   :  { %1404 = vmatpush.msra.mxu3 %v1336_v46 }
 0x52b   :  { %1463 = vmatmul.msk.f32.vlgmr.msra.gmra.mxu3 %vm1345_vm12, %v1338_v62 }
 0x533   :  { %v1311_v2 = vpop.f32.mrf.mxu1 }
 0x534   :  { %v1312_v5 = vadd.f32 %v1311_v2, %v1168_v50 }
 0x536   :  { %v1332_v41 = vadd.f32 %v1331_v7, %v1312_v5 }
 0x538   :  { %v1337_v26 = vmax.f32 %v1332_v41, 0.0 }
 0x53a   :  { %1424 = vmatpush.msra.mxu2 %v1337_v26 }
 0x53b   :  { %1464 = vmatmul.msk.f32.vlgmr.msra.gmra.mxu2 %vm1345_vm12, %v1338_v62 }
 0x59e   :  { %v1366_v51 = vpop.f32.mrf.mxu3 }
 0x59f   :  { %v1367_v8 = vadd.f32 %v1366_v51, %v1343_v58 }
 0x5a4   :  { %v1386_v54 = vpop.f32.mrf.mxu2 }
 0x5a5   :  { %v1387_v21 = vadd.f32 %v1386_v54, %v1343_v58 }
 0x5a7   :  { %v1433_v49 = vrot.slane %v1387_v21, 4 }
 0x5a9   :  { %v1435_v10 = vsel %vm408_vm6, %v1367_v8, %v1433_v49 }
 0x5aa   :  { %1439 = vst [vmem:[%s2670_s13] sm:$0x77] %v1435_v10 }
 0x5ae   :  { %v1406_v4 = vpop.f32.mrf.mxu3 }
 0x5af   :  { %v1407_v12 = vadd.f32 %v1406_v4, %v1343_v58 }
 0x5be   :  { %v1426_v29 = vpop.f32.mrf.mxu2 }
 0x5bf   :  { %v1427_v34 = vadd.f32 %v1426_v29, %v1343_v58 }
 0x5c1   :  { %v1434_v36 = vrot.slane %v1427_v34, 4 }
 0x5c3   :  { %v1436_v55 = vsel %vm408_vm6, %v1407_v12, %v1434_v36 }
 0x5c4   :  { %1440 = vst [vmem:[%s2670_s13 + $0x8] sm:$0x77] %v1436_v55 }
 0x5c5   :  { %1445 = vsyncpa [#allocation3], 1 }
 0x5c6   :  { %1446 = vsyncpa [#allocation5], 1 }

</bundles_post_ra>
